<compile_context>
chip_gen: v6e
topology: v6e:2x2x1
jax: 0.10.0
libtpu: 0.0.40
codegen_flags: <defaults>
</compile_context>

<pallas_src>
import functools

import jax
import jax.numpy as jnp
from jax.experimental import pallas as pl
from jax.experimental.pallas import tpu as pltpu


# ----------------------------------------------------------------------------
# Pallas kernel: matmul + bias + fused activation (full-K block, 2-D grid)
# ----------------------------------------------------------------------------
def _mm_bias_act_kernel(a_ref, b_ref, bias_ref, o_ref, *, act):
    # Full K in a single block -> single dot, no accumulator scratch needed.
    r = jnp.dot(a_ref[...], b_ref[...], preferred_element_type=jnp.float32)
    r = r + bias_ref[...]                      # bias (1, tn) broadcasts
    if act == "relu":
        r = jnp.maximum(r, 0.0)
    elif act == "leaky":
        r = jnp.where(r > 0.0, r, 0.2 * r)
    elif act == "sigmoid":
        r = jax.nn.sigmoid(r)
    o_ref[...] = r.astype(o_ref.dtype)


def matmul_bias_act(a, b, bias2d, act="none", out_dtype=jnp.float32,
                    tm=256, tn=256):
    """a: [M, K] bf16, b: [K, N] bf16, bias2d: [1, N] f32 -> [M, N] out_dtype.

    K lives in a single block (K <= a few hundred for every layer here).
    M / N are tiled with ragged boundary blocks handled by Pallas, so no
    pad-in / slice-out HBM round trips are needed.
    """
    M, K = a.shape
    K2, N = b.shape
    assert K == K2

    # Single full-dim block when the dim is small (legal: equals the array dim),
    # otherwise a (8,128)-aligned tile with a ragged last block.
    tm = M if M <= tm else tm
    tn = N if N <= tn else tn

    return pl.pallas_call(
        functools.partial(_mm_bias_act_kernel, act=act),
        out_shape=jax.ShapeDtypeStruct((M, N), out_dtype),
        grid_spec=pltpu.PrefetchScalarGridSpec(
            num_scalar_prefetch=0,
            grid=(pl.cdiv(M, tm), pl.cdiv(N, tn)),
            in_specs=[
                pl.BlockSpec((tm, K), lambda i, j: (i, 0)),
                pl.BlockSpec((K, tn), lambda i, j: (0, j)),
                pl.BlockSpec((1, tn), lambda i, j: (0, j)),
            ],
            out_specs=pl.BlockSpec((tm, tn), lambda i, j: (i, j)),
        ),
        compiler_params=pltpu.CompilerParams(
            dimension_semantics=("parallel", "parallel")
        ),
    )(a, b, bias2d)


# ----------------------------------------------------------------------------
# Conv2d = im2col (XLA glue, fused under jit) + Pallas matmul kernel
# ----------------------------------------------------------------------------
def _im2col(x, kh, kw, stride, pad):
    # TODO(synk): patch extraction stays as XLA glue (fused under jit); moving
    # im2col fully inside the Pallas kernel (NHWC window BlockSpec, shifted
    # dots against a resident weight tile) is the remaining HBM-traffic lever.
    N, C, H, W = x.shape
    if pad:
        x = jnp.pad(x, ((0, 0), (0, 0), (pad, pad), (pad, pad)))
    OH = (H + 2 * pad - kh) // stride + 1
    OW = (W + 2 * pad - kw) // stride + 1
    cols = []
    for i in range(kh):
        for j in range(kw):
            cols.append(
                x[:, :, i:i + stride * OH:stride, j:j + stride * OW:stride]
            )
    p = jnp.stack(cols, axis=1)                         # [N, kh*kw, C, OH, OW]
    p = p.transpose(0, 3, 4, 1, 2).reshape(N * OH * OW, kh * kw * C)
    return p, OH, OW


def conv2d_pallas(x, wmat, bias2d, kh, kw, stride=1, pad=0, act="none",
                  out_dtype=jnp.bfloat16):
    """x: [N, Cin, H, W]; wmat: [kh*kw*Cin, Cout] bf16 (pre-reshaped at init);
    bias2d: [1, Cout] f32."""
    N = x.shape[0]
    Cout = wmat.shape[1]
    patches, OH, OW = _im2col(x.astype(jnp.bfloat16), kh, kw, stride, pad)
    out = matmul_bias_act(patches, wmat, bias2d, act=act, out_dtype=out_dtype)
    return out.reshape(N, OH, OW, Cout).transpose(0, 3, 1, 2)


# ----------------------------------------------------------------------------
# Deterministic parameter construction (reshape / cast hoisted to init time)
# ----------------------------------------------------------------------------
def _init_conv(key, cout, cin, kh, kw):
    k1, k2 = jax.random.split(key)
    fan_in = float(cin * kh * kw)
    w = jax.random.normal(k1, (cout, cin, kh, kw), jnp.float32) * (fan_in ** -0.5)
    b = jax.random.normal(k2, (cout,), jnp.float32) * 0.01
    # PyTorch [Cout,Cin,kh,kw] -> matmul weight [kh*kw*Cin, Cout], bf16 at init.
    wmat = jnp.transpose(w, (2, 3, 1, 0)).reshape(kh * kw * cin, cout)
    return wmat.astype(jnp.bfloat16), b.reshape(1, cout)


def make_params(num_classes, seed=0):
    key = jax.random.PRNGKey(seed)
    keys = jax.random.split(key, 8)
    ndf = 16
    params = {
        # TODO(synk): stand-in for DeeplabMulti (ResNet-101 backbone not given).
        "bb1": _init_conv(keys[0], 16, 3, 3, 3),
        "bb2": _init_conv(keys[1], 32, 16, 3, 3),
        "bb3": _init_conv(keys[2], num_classes, 32, 3, 3),
        # TODO(synk): stand-in for FCDiscriminator_CCA1 (definition not given);
        # the unused global_out / pred_D heads are dropped (dead code in
        # Ours_Model.forward -- only class_out feeds the returned `pred`).
        "d1": _init_conv(keys[3], ndf, num_classes, 4, 4),
        "d2": _init_conv(keys[4], 2 * ndf, ndf, 4, 4),
        "d_class": _init_conv(keys[6], num_classes, 2 * ndf, 1, 1),
        # TODO(synk): stand-in for CCA_Classifier_V1 (definition not given);
        # the unused pred1 head is dropped (dead code).
        "cls2": _init_conv(keys[7], num_classes, num_classes, 3, 3),
    }
    return params


# ----------------------------------------------------------------------------
# Ours_Model.forward (jitted: glue fuses, dead code is gone, dispatch amortized)
# ----------------------------------------------------------------------------
@functools.partial(jax.jit, static_argnames=("num_classes",))
def ours_model_forward(params, x, num_classes):
    # ---- self.model(x): DeeplabMulti stand-in ------------------------------
    h = conv2d_pallas(x, *params["bb1"], kh=3, kw=3, stride=2, pad=1, act="relu")
    h = conv2d_pallas(h, *params["bb2"], kh=3, kw=3, stride=2, pad=1, act="relu")
    feature = conv2d_pallas(h, *params["bb3"], kh=3, kw=3, stride=1, pad=1,
                            act="none")
    fh, fw = feature.shape[2], feature.shape[3]

    # ---- self.model_D(feature): FCDiscriminator_CCA1 stand-in --------------
    d = conv2d_pallas(feature, *params["d1"], kh=4, kw=4, stride=2, pad=1,
                      act="leaky")
    d = conv2d_pallas(d, *params["d2"], kh=4, kw=4, stride=2, pad=1,
                      act="leaky")
    # F.sigmoid(class_out) fused into the Pallas conv epilogue:
    sig_class_out = conv2d_pallas(d, *params["d_class"], kh=1, kw=1, stride=1,
                                  pad=0, act="sigmoid", out_dtype=jnp.float32)

    # ---- nn.Upsample(size=(fh, fw), mode='bilinear') on sigmoid(class_out) -
    # TODO(synk): bilinear resampling kept as jax.image.resize glue
    # (align_corners=False semantics), not a Pallas kernel.
    D_out = jax.image.resize(
        sig_class_out,
        (sig_class_out.shape[0], num_classes, fh, fw),
        method="bilinear",
    )

    # ---- self.classifier(feature, D_out): CCA_Classifier_V1 stand-in -------
    # Channel-attention fusion feature * (1 + D_out): left to XLA so it fuses
    # with the im2col glue of the following conv (no extra HBM round trip or
    # masked-partial-store Pallas kernel).
    fused = feature.astype(jnp.float32) * (1.0 + D_out)
    pred = conv2d_pallas(fused, *params["cls2"], kh=3, kw=3, stride=1, pad=1,
                         act="none", out_dtype=jnp.float32)
    return pred


if __name__ == "__main__":
    num_classes = 5
    params = make_params(num_classes, seed=0)

    key = jax.random.PRNGKey(0)
    x = jax.random.normal(key, (2, 3, 32, 32), jnp.float32)   # NCHW, like PyTorch

    pred = ours_model_forward(params, x, num_classes=num_classes)
    pred = jax.block_until_ready(pred)

    assert pred.shape == (2, num_classes, 8, 8), pred.shape
    print("KERNEL_OK")
</pallas_src>

<mosaic_0001>
module attributes {stable_mosaic.version = 11 : i64} {
  func.func @_mm_bias_act_kernel(%arg0: i32, %arg1: i32, %arg2: memref<256x27xbf16, #tpu.memory_space<vmem>>, %arg3: memref<27x16xbf16, #tpu.memory_space<vmem>>, %arg4: memref<1x16xf32, #tpu.memory_space<vmem>>, %arg5: memref<256x16xbf16, #tpu.memory_space<vmem>>) attributes {dimension_semantics = [#tpu.dimension_semantics<parallel>, #tpu.dimension_semantics<parallel>], iteration_bounds = array<i64: 2, 1>, scalar_prefetch = 0 : i64, scratch_operands = 0 : i64, tpu.core_type = #tpu.core_type<tc>, window_params = [{transform_indices = @transform_0, window_bounds = array<i64: 256, 27>}, {transform_indices = @transform_1, window_bounds = array<i64: 27, 16>}, {transform_indices = @transform_2, window_bounds = array<i64: 1, 16>}, {transform_indices = @transform_3, window_bounds = array<i64: 256, 16>}]} {
    %c0 = arith.constant 0 : index
    %c0_0 = arith.constant 0 : index
    %0 = vector.load %arg2[%c0, %c0_0] : memref<256x27xbf16, #tpu.memory_space<vmem>>, vector<256x27xbf16>
    %c0_1 = arith.constant 0 : index
    %c0_2 = arith.constant 0 : index
    %1 = vector.load %arg3[%c0_1, %c0_2] : memref<27x16xbf16, #tpu.memory_space<vmem>>, vector<27x16xbf16>
    %cst = arith.constant dense<0.000000e+00> : vector<256x16xf32>
    %2 = tpu.matmul %0, %1, %cst {dimension_numbers = #tpu.dot_dimension_numbers<[1], [0], [0], [1], [0, 0, 1, 1], [], []>} : vector<256x27xbf16>, vector<27x16xbf16>, vector<256x16xf32> -> vector<256x16xf32>
    %c0_3 = arith.constant 0 : index
    %c0_4 = arith.constant 0 : index
    %3 = vector.load %arg4[%c0_3, %c0_4] : memref<1x16xf32, #tpu.memory_space<vmem>>, vector<1x16xf32>
    %4 = vector.broadcast %3 : vector<1x16xf32> to vector<256x16xf32>
    %5 = arith.addf %2, %4 : vector<256x16xf32>
    %cst_5 = arith.constant 0.000000e+00 : f32
    %6 = vector.broadcast %cst_5 : f32 to vector<256x16xf32>
    %7 = arith.maximumf %5, %6 : vector<256x16xf32>
    %8 = arith.truncf %7 : vector<256x16xf32> to vector<256x16xbf16>
    %c0_6 = arith.constant 0 : index
    %c0_7 = arith.constant 0 : index
    %9 = vector.load %arg5[%c0_6, %c0_7] : memref<256x16xbf16, #tpu.memory_space<vmem>>, vector<256x16xbf16>
    tpu.vector_store %arg5[%c0_6, %c0_7], %8 {strides = array<i32>} : memref<256x16xbf16, #tpu.memory_space<vmem>>, vector<256x16xbf16>,
    return
  }
  func.func @transform_0(%arg0: i32, %arg1: i32) -> (i32, i32) {
    %c0_i32 = arith.constant 0 : i32
    %c0_i32_0 = arith.constant 0 : i32
    return %arg0, %c0_i32 : i32, i32
  }
  func.func @transform_1(%arg0: i32, %arg1: i32) -> (i32, i32) {
    %c0_i32 = arith.constant 0 : i32
    %c0_i32_0 = arith.constant 0 : i32
    return %c0_i32, %arg1 : i32, i32
  }
  func.func @transform_2(%arg0: i32, %arg1: i32) -> (i32, i32) {
    %c0_i32 = arith.constant 0 : i32
    %c0_i32_0 = arith.constant 0 : i32
    return %c0_i32, %arg1 : i32, i32
  }
  func.func @transform_3(%arg0: i32, %arg1: i32) -> (i32, i32) {
    %c0_i32 = arith.constant 0 : i32
    return %arg0, %arg1 : i32, i32
  }
}

module attributes {stable_mosaic.version = 11 : i64} {
  func.func @_mm_bias_act_kernel(%arg0: i32, %arg1: i32, %arg2: memref<128x144xbf16, #tpu.memory_space<vmem>>, %arg3: memref<144x32xbf16, #tpu.memory_space<vmem>>, %arg4: memref<1x32xf32, #tpu.memory_space<vmem>>, %arg5: memref<128x32xbf16, #tpu.memory_space<vmem>>) attributes {dimension_semantics = [#tpu.dimension_semantics<parallel>, #tpu.dimension_semantics<parallel>], iteration_bounds = array<i64: 1, 1>, scalar_prefetch = 0 : i64, scratch_operands = 0 : i64, tpu.core_type = #tpu.core_type<tc>, window_params = [{transform_indices = @transform_0, window_bounds = array<i64: 128, 144>}, {transform_indices = @transform_1, window_bounds = array<i64: 144, 32>}, {transform_indices = @transform_2, window_bounds = array<i64: 1, 32>}, {transform_indices = @transform_3, window_bounds = array<i64: 128, 32>}]} {
    %c0 = arith.constant 0 : index
    %c0_0 = arith.constant 0 : index
    %0 = vector.load %arg2[%c0, %c0_0] : memref<128x144xbf16, #tpu.memory_space<vmem>>, vector<128x144xbf16>
    %c0_1 = arith.constant 0 : index
    %c0_2 = arith.constant 0 : index
    %1 = vector.load %arg3[%c0_1, %c0_2] : memref<144x32xbf16, #tpu.memory_space<vmem>>, vector<144x32xbf16>
    %cst = arith.constant dense<0.000000e+00> : vector<128x32xf32>
    %2 = tpu.matmul %0, %1, %cst {dimension_numbers = #tpu.dot_dimension_numbers<[1], [0], [0], [1], [0, 0, 1, 1], [], []>} : vector<128x144xbf16>, vector<144x32xbf16>, vector<128x32xf32> -> vector<128x32xf32>
    %c0_3 = arith.constant 0 : index
    %c0_4 = arith.constant 0 : index
    %3 = vector.load %arg4[%c0_3, %c0_4] : memref<1x32xf32, #tpu.memory_space<vmem>>, vector<1x32xf32>
    %4 = vector.broadcast %3 : vector<1x32xf32> to vector<128x32xf32>
    %5 = arith.addf %2, %4 : vector<128x32xf32>
    %cst_5 = arith.constant 0.000000e+00 : f32
    %6 = vector.broadcast %cst_5 : f32 to vector<128x32xf32>
    %7 = arith.maximumf %5, %6 : vector<128x32xf32>
    %8 = arith.truncf %7 : vector<128x32xf32> to vector<128x32xbf16>
    %c0_6 = arith.constant 0 : index
    %c0_7 = arith.constant 0 : index
    %9 = vector.load %arg5[%c0_6, %c0_7] : memref<128x32xbf16, #tpu.memory_space<vmem>>, vector<128x32xbf16>
    tpu.vector_store %arg5[%c0_6, %c0_7], %8 {strides = array<i32>} : memref<128x32xbf16, #tpu.memory_space<vmem>>, vector<128x32xbf16>,
    return
  }
  func.func @transform_0(%arg0: i32, %arg1: i32) -> (i32, i32) {
    %c0_i32 = arith.constant 0 : i32
    %c0_i32_0 = arith.constant 0 : i32
    return %arg0, %c0_i32 : i32, i32
  }
  func.func @transform_1(%arg0: i32, %arg1: i32) -> (i32, i32) {
    %c0_i32 = arith.constant 0 : i32
    %c0_i32_0 = arith.constant 0 : i32
    return %c0_i32, %arg1 : i32, i32
  }
  func.func @transform_2(%arg0: i32, %arg1: i32) -> (i32, i32) {
    %c0_i32 = arith.constant 0 : i32
    %c0_i32_0 = arith.constant 0 : i32
    return %c0_i32, %arg1 : i32, i32
  }
  func.func @transform_3(%arg0: i32, %arg1: i32) -> (i32, i32) {
    %c0_i32 = arith.constant 0 : i32
    return %arg0, %arg1 : i32, i32
  }
}

module attributes {stable_mosaic.version = 11 : i64} {
  func.func @_mm_bias_act_kernel(%arg0: i32, %arg1: i32, %arg2: memref<128x288xbf16, #tpu.memory_space<vmem>>, %arg3: memref<288x5xbf16, #tpu.memory_space<vmem>>, %arg4: memref<1x5xf32, #tpu.memory_space<vmem>>, %arg5: memref<128x5xbf16, #tpu.memory_space<vmem>>) attributes {dimension_semantics = [#tpu.dimension_semantics<parallel>, #tpu.dimension_semantics<parallel>], iteration_bounds = array<i64: 1, 1>, scalar_prefetch = 0 : i64, scratch_operands = 0 : i64, tpu.core_type = #tpu.core_type<tc>, window_params = [{transform_indices = @transform_0, window_bounds = array<i64: 128, 288>}, {transform_indices = @transform_1, window_bounds = array<i64: 288, 5>}, {transform_indices = @transform_2, window_bounds = array<i64: 1, 5>}, {transform_indices = @transform_3, window_bounds = array<i64: 128, 5>}]} {
    %c0 = arith.constant 0 : index
    %c0_0 = arith.constant 0 : index
    %0 = vector.load %arg2[%c0, %c0_0] : memref<128x288xbf16, #tpu.memory_space<vmem>>, vector<128x288xbf16>
    %c0_1 = arith.constant 0 : index
    %c0_2 = arith.constant 0 : index
    %1 = vector.load %arg3[%c0_1, %c0_2] : memref<288x5xbf16, #tpu.memory_space<vmem>>, vector<288x5xbf16>
    %cst = arith.constant dense<0.000000e+00> : vector<128x5xf32>
    %2 = tpu.matmul %0, %1, %cst {dimension_numbers = #tpu.dot_dimension_numbers<[1], [0], [0], [1], [0, 0, 1, 1], [], []>} : vector<128x288xbf16>, vector<288x5xbf16>, vector<128x5xf32> -> vector<128x5xf32>
    %c0_3 = arith.constant 0 : index
    %c0_4 = arith.constant 0 : index
    %3 = vector.load %arg4[%c0_3, %c0_4] : memref<1x5xf32, #tpu.memory_space<vmem>>, vector<1x5xf32>
    %4 = vector.broadcast %3 : vector<1x5xf32> to vector<128x5xf32>
    %5 = arith.addf %2, %4 : vector<128x5xf32>
    %6 = arith.truncf %5 : vector<128x5xf32> to vector<128x5xbf16>
    %c0_5 = arith.constant 0 : index
    %c0_6 = arith.constant 0 : index
    %7 = vector.load %arg5[%c0_5, %c0_6] : memref<128x5xbf16, #tpu.memory_space<vmem>>, vector<128x5xbf16>
    tpu.vector_store %arg5[%c0_5, %c0_6], %6 {strides = array<i32>} : memref<128x5xbf16, #tpu.memory_space<vmem>>, vector<128x5xbf16>,
    return
  }
  func.func @transform_0(%arg0: i32, %arg1: i32) -> (i32, i32) {
    %c0_i32 = arith.constant 0 : i32
    %c0_i32_0 = arith.constant 0 : i32
    return %arg0, %c0_i32 : i32, i32
  }
  func.func @transform_1(%arg0: i32, %arg1: i32) -> (i32, i32) {
    %c0_i32 = arith.constant 0 : i32
    %c0_i32_0 = arith.constant 0 : i32
    return %c0_i32, %arg1 : i32, i32
  }
  func.func @transform_2(%arg0: i32, %arg1: i32) -> (i32, i32) {
    %c0_i32 = arith.constant 0 : i32
    %c0_i32_0 = arith.constant 0 : i32
    return %c0_i32, %arg1 : i32, i32
  }
  func.func @transform_3(%arg0: i32, %arg1: i32) -> (i32, i32) {
    %c0_i32 = arith.constant 0 : i32
    return %arg0, %arg1 : i32, i32
  }
}

module attributes {stable_mosaic.version = 11 : i64} {
  func.func @_mm_bias_act_kernel(%arg0: i32, %arg1: i32, %arg2: memref<32x80xbf16, #tpu.memory_space<vmem>>, %arg3: memref<80x16xbf16, #tpu.memory_space<vmem>>, %arg4: memref<1x16xf32, #tpu.memory_space<vmem>>, %arg5: memref<32x16xbf16, #tpu.memory_space<vmem>>) attributes {dimension_semantics = [#tpu.dimension_semantics<parallel>, #tpu.dimension_semantics<parallel>], iteration_bounds = array<i64: 1, 1>, scalar_prefetch = 0 : i64, scratch_operands = 0 : i64, tpu.core_type = #tpu.core_type<tc>, window_params = [{transform_indices = @transform_0, window_bounds = array<i64: 32, 80>}, {transform_indices = @transform_1, window_bounds = array<i64: 80, 16>}, {transform_indices = @transform_2, window_bounds = array<i64: 1, 16>}, {transform_indices = @transform_3, window_bounds = array<i64: 32, 16>}]} {
    %c0 = arith.constant 0 : index
    %c0_0 = arith.constant 0 : index
    %0 = vector.load %arg2[%c0, %c0_0] : memref<32x80xbf16, #tpu.memory_space<vmem>>, vector<32x80xbf16>
    %c0_1 = arith.constant 0 : index
    %c0_2 = arith.constant 0 : index
    %1 = vector.load %arg3[%c0_1, %c0_2] : memref<80x16xbf16, #tpu.memory_space<vmem>>, vector<80x16xbf16>
    %cst = arith.constant dense<0.000000e+00> : vector<32x16xf32>
    %2 = tpu.matmul %0, %1, %cst {dimension_numbers = #tpu.dot_dimension_numbers<[1], [0], [0], [1], [0, 0, 1, 1], [], []>} : vector<32x80xbf16>, vector<80x16xbf16>, vector<32x16xf32> -> vector<32x16xf32>
    %c0_3 = arith.constant 0 : index
    %c0_4 = arith.constant 0 : index
    %3 = vector.load %arg4[%c0_3, %c0_4] : memref<1x16xf32, #tpu.memory_space<vmem>>, vector<1x16xf32>
    %4 = vector.broadcast %3 : vector<1x16xf32> to vector<32x16xf32>
    %5 = arith.addf %2, %4 : vector<32x16xf32>
    %cst_5 = arith.constant 0.000000e+00 : f32
    %6 = vector.broadcast %cst_5 : f32 to vector<32x16xf32>
    %7 = arith.cmpf ogt, %5, %6 : vector<32x16xf32>
    %cst_6 = arith.constant 2.000000e-01 : f32
    %8 = vector.broadcast %cst_6 : f32 to vector<32x16xf32>
    %9 = arith.mulf %8, %5 : vector<32x16xf32>
    %10 = arith.select %7, %5, %9 : vector<32x16xi1>, vector<32x16xf32>
    %11 = arith.truncf %10 : vector<32x16xf32> to vector<32x16xbf16>
    %c0_7 = arith.constant 0 : index
    %c0_8 = arith.constant 0 : index
    %12 = vector.load %arg5[%c0_7, %c0_8] : memref<32x16xbf16, #tpu.memory_space<vmem>>, vector<32x16xbf16>
    tpu.vector_store %arg5[%c0_7, %c0_8], %11 {strides = array<i32>} : memref<32x16xbf16, #tpu.memory_space<vmem>>, vector<32x16xbf16>,
    return
  }
  func.func @transform_0(%arg0: i32, %arg1: i32) -> (i32, i32) {
    %c0_i32 = arith.constant 0 : i32
    %c0_i32_0 = arith.constant 0 : i32
    return %arg0, %c0_i32 : i32, i32
  }
  func.func @transform_1(%arg0: i32, %arg1: i32) -> (i32, i32) {
    %c0_i32 = arith.constant 0 : i32
    %c0_i32_0 = arith.constant 0 : i32
    return %c0_i32, %arg1 : i32, i32
  }
  func.func @transform_2(%arg0: i32, %arg1: i32) -> (i32, i32) {
    %c0_i32 = arith.constant 0 : i32
    %c0_i32_0 = arith.constant 0 : i32
    return %c0_i32, %arg1 : i32, i32
  }
  func.func @transform_3(%arg0: i32, %arg1: i32) -> (i32, i32) {
    %c0_i32 = arith.constant 0 : i32
    return %arg0, %arg1 : i32, i32
  }
}

module attributes {stable_mosaic.version = 11 : i64} {
  func.func @_mm_bias_act_kernel(%arg0: i32, %arg1: i32, %arg2: memref<8x256xbf16, #tpu.memory_space<vmem>>, %arg3: memref<256x32xbf16, #tpu.memory_space<vmem>>, %arg4: memref<1x32xf32, #tpu.memory_space<vmem>>, %arg5: memref<8x32xbf16, #tpu.memory_space<vmem>>) attributes {dimension_semantics = [#tpu.dimension_semantics<parallel>, #tpu.dimension_semantics<parallel>], iteration_bounds = array<i64: 1, 1>, scalar_prefetch = 0 : i64, scratch_operands = 0 : i64, tpu.core_type = #tpu.core_type<tc>, window_params = [{transform_indices = @transform_0, window_bounds = array<i64: 8, 256>}, {transform_indices = @transform_1, window_bounds = array<i64: 256, 32>}, {transform_indices = @transform_2, window_bounds = array<i64: 1, 32>}, {transform_indices = @transform_3, window_bounds = array<i64: 8, 32>}]} {
    %c0 = arith.constant 0 : index
    %c0_0 = arith.constant 0 : index
    %0 = vector.load %arg2[%c0, %c0_0] : memref<8x256xbf16, #tpu.memory_space<vmem>>, vector<8x256xbf16>
    %c0_1 = arith.constant 0 : index
    %c0_2 = arith.constant 0 : index
    %1 = vector.load %arg3[%c0_1, %c0_2] : memref<256x32xbf16, #tpu.memory_space<vmem>>, vector<256x32xbf16>
    %cst = arith.constant dense<0.000000e+00> : vector<8x32xf32>
    %2 = tpu.matmul %0, %1, %cst {dimension_numbers = #tpu.dot_dimension_numbers<[1], [0], [0], [1], [0, 0, 1, 1], [], []>} : vector<8x256xbf16>, vector<256x32xbf16>, vector<8x32xf32> -> vector<8x32xf32>
    %c0_3 = arith.constant 0 : index
    %c0_4 = arith.constant 0 : index
    %3 = vector.load %arg4[%c0_3, %c0_4] : memref<1x32xf32, #tpu.memory_space<vmem>>, vector<1x32xf32>
    %4 = vector.broadcast %3 : vector<1x32xf32> to vector<8x32xf32>
    %5 = arith.addf %2, %4 : vector<8x32xf32>
    %cst_5 = arith.constant 0.000000e+00 : f32
    %6 = vector.broadcast %cst_5 : f32 to vector<8x32xf32>
    %7 = arith.cmpf ogt, %5, %6 : vector<8x32xf32>
    %cst_6 = arith.constant 2.000000e-01 : f32
    %8 = vector.broadcast %cst_6 : f32 to vector<8x32xf32>
    %9 = arith.mulf %8, %5 : vector<8x32xf32>
    %10 = arith.select %7, %5, %9 : vector<8x32xi1>, vector<8x32xf32>
    %11 = arith.truncf %10 : vector<8x32xf32> to vector<8x32xbf16>
    %c0_7 = arith.constant 0 : index
    %c0_8 = arith.constant 0 : index
    %12 = vector.load %arg5[%c0_7, %c0_8] : memref<8x32xbf16, #tpu.memory_space<vmem>>, vector<8x32xbf16>
    tpu.vector_store %arg5[%c0_7, %c0_8], %11 {strides = array<i32>} : memref<8x32xbf16, #tpu.memory_space<vmem>>, vector<8x32xbf16>,
    return
  }
  func.func @transform_0(%arg0: i32, %arg1: i32) -> (i32, i32) {
    %c0_i32 = arith.constant 0 : i32
    %c0_i32_0 = arith.constant 0 : i32
    return %arg0, %c0_i32 : i32, i32
  }
  func.func @transform_1(%arg0: i32, %arg1: i32) -> (i32, i32) {
    %c0_i32 = arith.constant 0 : i32
    %c0_i32_0 = arith.constant 0 : i32
    return %c0_i32, %arg1 : i32, i32
  }
  func.func @transform_2(%arg0: i32, %arg1: i32) -> (i32, i32) {
    %c0_i32 = arith.constant 0 : i32
    %c0_i32_0 = arith.constant 0 : i32
    return %c0_i32, %arg1 : i32, i32
  }
  func.func @transform_3(%arg0: i32, %arg1: i32) -> (i32, i32) {
    %c0_i32 = arith.constant 0 : i32
    return %arg0, %arg1 : i32, i32
  }
}

module attributes {stable_mosaic.version = 11 : i64} {
  func.func @_mm_bias_act_kernel(%arg0: i32, %arg1: i32, %arg2: memref<8x32xbf16, #tpu.memory_space<vmem>>, %arg3: memref<32x5xbf16, #tpu.memory_space<vmem>>, %arg4: memref<1x5xf32, #tpu.memory_space<vmem>>, %arg5: memref<8x5xf32, #tpu.memory_space<vmem>>) attributes {dimension_semantics = [#tpu.dimension_semantics<parallel>, #tpu.dimension_semantics<parallel>], iteration_bounds = array<i64: 1, 1>, scalar_prefetch = 0 : i64, scratch_operands = 0 : i64, tpu.core_type = #tpu.core_type<tc>, window_params = [{transform_indices = @transform_0, window_bounds = array<i64: 8, 32>}, {transform_indices = @transform_1, window_bounds = array<i64: 32, 5>}, {transform_indices = @transform_2, window_bounds = array<i64: 1, 5>}, {transform_indices = @transform_3, window_bounds = array<i64: 8, 5>}]} {
    %c0 = arith.constant 0 : index
    %c0_0 = arith.constant 0 : index
    %0 = vector.load %arg2[%c0, %c0_0] : memref<8x32xbf16, #tpu.memory_space<vmem>>, vector<8x32xbf16>
    %c0_1 = arith.constant 0 : index
    %c0_2 = arith.constant 0 : index
    %1 = vector.load %arg3[%c0_1, %c0_2] : memref<32x5xbf16, #tpu.memory_space<vmem>>, vector<32x5xbf16>
    %cst = arith.constant dense<0.000000e+00> : vector<8x5xf32>
    %2 = tpu.matmul %0, %1, %cst {dimension_numbers = #tpu.dot_dimension_numbers<[1], [0], [0], [1], [0, 0, 1, 1], [], []>} : vector<8x32xbf16>, vector<32x5xbf16>, vector<8x5xf32> -> vector<8x5xf32>
    %c0_3 = arith.constant 0 : index
    %c0_4 = arith.constant 0 : index
    %3 = vector.load %arg4[%c0_3, %c0_4] : memref<1x5xf32, #tpu.memory_space<vmem>>, vector<1x5xf32>
    %4 = vector.broadcast %3 : vector<1x5xf32> to vector<8x5xf32>
    %5 = arith.addf %2, %4 : vector<8x5xf32>
    %6 = arith.negf %5 : vector<8x5xf32>
    %7 = math.exp %6 : vector<8x5xf32>
    %cst_5 = arith.constant 1.000000e+00 : f32
    %8 = vector.broadcast %cst_5 : f32 to vector<8x5xf32>
    %9 = arith.addf %8, %7 : vector<8x5xf32>
    %10 = arith.divf %8, %9 : vector<8x5xf32>
    %c0_6 = arith.constant 0 : index
    %c0_7 = arith.constant 0 : index
    %11 = vector.load %arg5[%c0_6, %c0_7] : memref<8x5xf32, #tpu.memory_space<vmem>>, vector<8x5xf32>
    tpu.vector_store %arg5[%c0_6, %c0_7], %10 {strides = array<i32>} : memref<8x5xf32, #tpu.memory_space<vmem>>, vector<8x5xf32>,
    return
  }
  func.func @transform_0(%arg0: i32, %arg1: i32) -> (i32, i32) {
    %c0_i32 = arith.constant 0 : i32
    %c0_i32_0 = arith.constant 0 : i32
    return %arg0, %c0_i32 : i32, i32
  }
  func.func @transform_1(%arg0: i32, %arg1: i32) -> (i32, i32) {
    %c0_i32 = arith.constant 0 : i32
    %c0_i32_0 = arith.constant 0 : i32
    return %c0_i32, %arg1 : i32, i32
  }
  func.func @transform_2(%arg0: i32, %arg1: i32) -> (i32, i32) {
    %c0_i32 = arith.constant 0 : i32
    %c0_i32_0 = arith.constant 0 : i32
    return %c0_i32, %arg1 : i32, i32
  }
  func.func @transform_3(%arg0: i32, %arg1: i32) -> (i32, i32) {
    %c0_i32 = arith.constant 0 : i32
    return %arg0, %arg1 : i32, i32
  }
}

module attributes {stable_mosaic.version = 11 : i64} {
  func.func @_mm_bias_act_kernel(%arg0: i32, %arg1: i32, %arg2: memref<128x45xbf16, #tpu.memory_space<vmem>>, %arg3: memref<45x5xbf16, #tpu.memory_space<vmem>>, %arg4: memref<1x5xf32, #tpu.memory_space<vmem>>, %arg5: memref<128x5xf32, #tpu.memory_space<vmem>>) attributes {dimension_semantics = [#tpu.dimension_semantics<parallel>, #tpu.dimension_semantics<parallel>], iteration_bounds = array<i64: 1, 1>, scalar_prefetch = 0 : i64, scratch_operands = 0 : i64, tpu.core_type = #tpu.core_type<tc>, window_params = [{transform_indices = @transform_0, window_bounds = array<i64: 128, 45>}, {transform_indices = @transform_1, window_bounds = array<i64: 45, 5>}, {transform_indices = @transform_2, window_bounds = array<i64: 1, 5>}, {transform_indices = @transform_3, window_bounds = array<i64: 128, 5>}]} {
    %c0 = arith.constant 0 : index
    %c0_0 = arith.constant 0 : index
    %0 = vector.load %arg2[%c0, %c0_0] : memref<128x45xbf16, #tpu.memory_space<vmem>>, vector<128x45xbf16>
    %c0_1 = arith.constant 0 : index
    %c0_2 = arith.constant 0 : index
    %1 = vector.load %arg3[%c0_1, %c0_2] : memref<45x5xbf16, #tpu.memory_space<vmem>>, vector<45x5xbf16>
    %cst = arith.constant dense<0.000000e+00> : vector<128x5xf32>
    %2 = tpu.matmul %0, %1, %cst {dimension_numbers = #tpu.dot_dimension_numbers<[1], [0], [0], [1], [0, 0, 1, 1], [], []>} : vector<128x45xbf16>, vector<45x5xbf16>, vector<128x5xf32> -> vector<128x5xf32>
    %c0_3 = arith.constant 0 : index
    %c0_4 = arith.constant 0 : index
    %3 = vector.load %arg4[%c0_3, %c0_4] : memref<1x5xf32, #tpu.memory_space<vmem>>, vector<1x5xf32>
    %4 = vector.broadcast %3 : vector<1x5xf32> to vector<128x5xf32>
    %5 = arith.addf %2, %4 : vector<128x5xf32>
    %c0_5 = arith.constant 0 : index
    %c0_6 = arith.constant 0 : index
    %6 = vector.load %arg5[%c0_5, %c0_6] : memref<128x5xf32, #tpu.memory_space<vmem>>, vector<128x5xf32>
    tpu.vector_store %arg5[%c0_5, %c0_6], %5 {strides = array<i32>} : memref<128x5xf32, #tpu.memory_space<vmem>>, vector<128x5xf32>,
    return
  }
  func.func @transform_0(%arg0: i32, %arg1: i32) -> (i32, i32) {
    %c0_i32 = arith.constant 0 : i32
    %c0_i32_0 = arith.constant 0 : i32
    return %arg0, %c0_i32 : i32, i32
  }
  func.func @transform_1(%arg0: i32, %arg1: i32) -> (i32, i32) {
    %c0_i32 = arith.constant 0 : i32
    %c0_i32_0 = arith.constant 0 : i32
    return %c0_i32, %arg1 : i32, i32
  }
  func.func @transform_2(%arg0: i32, %arg1: i32) -> (i32, i32) {
    %c0_i32 = arith.constant 0 : i32
    %c0_i32_0 = arith.constant 0 : i32
    return %c0_i32, %arg1 : i32, i32
  }
  func.func @transform_3(%arg0: i32, %arg1: i32) -> (i32, i32) {
    %c0_i32 = arith.constant 0 : i32
    return %arg0, %arg1 : i32, i32
  }
}

</mosaic_0001>

<bundles_post_ra>
// kernel: ours_model_forward.7
= control target key start
LH: loop header
LB: loop body
LE: loop exit
PB: predicated region body
PF: predicated region fallthrough
CT: control target
= control target key end

     0   :  { %s1130_s12 = smov 0   ;;  %s1132_s13 = smov 0   ;;  %s1313_s0 = inlined_call_operand.vmem [shape: bf16[512,27], index: 0, kind: input, shape index: {}]   ;;  %s1314_s1 = inlined_call_operand.vmem [shape: bf16[27,16], index: 1, kind: input, shape index: {}]   ;;  %s1315_s2 = inlined_call_operand.vmem [shape: f32[1,16], index: 2, kind: input, shape index: {}]   ;;  %s1316_s3 = inlined_call_operand.vmem [shape: bf16[512,16], index: 3, kind: output, shape index: {}]  }
   0x1   :  { %s1134_s14 = smov 0  }
   0x2 LB: > { %s25_s15 = sadd.s32 1, %s1103_s13  ;;  %p878_p0 = scmp.ge.s32.totalorder %s1107_s14, 1  ;;  %s1107_s14 = sphi %s1134_s14, %s13_s14   ;;  %s1103_s13 = sphi %s1132_s13, %s1318_s13   ;;  %s1099_s12 = sphi %s1130_s12, %s1317_s12  }
   0x3   : > { %p27_p1 = scmp.ge.s32.totalorder %s25_s15, 2  ;;  %p169_p2 = scmp.lt.s32.totalorder %s1107_s14, 3 }
   0x5   : > { %s1320_s15 = smov (%p27_p1, %s25_s15), 0  ;;  %p170_p3 = pnand %p878_p0, %p169_p2 }
   0x6   : > { %s879_s18 = sshll.u32 (!%p170_p3), %s1099_s12, 5 }
   0x7   : > { %173 = sbr.rel (%p170_p3) target bundleno = 256 (0x100), region = 32  ;;  %p204_p4 = scmp.lt.s32.totalorder (!%p170_p3), %s879_s18, 63 }
   0xc   : > { %v1067_v0 = vld [vmem:[%s1314_s1 + $0x8] sm:$0x3f]   ;;  %vm409_vm0 = vcmask 1044480   ;;  %vm410_vm1 = vcmask 1045504   ;;  %v1109_v1 = vmov 65535   ;;  %v1068_v5 = vld [vmem:[%s1314_s1] sm:$0xff]  }
   0xd   : > { %v411_v2 = vsel %vm409_vm0, 4294967295, %v1109_v1  ;;  %s1322_s18 = smov (!%p204_p4, %s879_s18), 63  ;;  %vm360_vm2 = vcmask 220160   ;;  %v1199_v22 = vld [vmem:[%s1315_s2] ss:$0 sm:$0xff]  ;;  %vm737_vm3 = vcmask 125952  }
   0xe   : > { %v412_v3 = vsel %vm410_vm1, %v411_v2, 0  ;;  %s880_s21 = sshll.u32 %s1322_s18, 2 }
   0xf   : > { %v414_v4 = vand.u32 %v1067_v0, %v412_v3  ;;  %s1162_s24 = scalar_lea.vmem %s1313_s0, %s880_s21  ;;  %s1210_s29 = scalar_lea.vmem %s1316_s3, %s880_s21 }
  0x10   : > { %v1069_v6 = vld [vmem:[%s1162_s24] sm:$0xff]   ;;  %v1071_v8 = vld [vmem:[%s1162_s24 + $0x8] sm:$0xff]   ;;  %v1073_v10 = vld [vmem:[%s1162_s24 + $0x10] sm:$0xff]  }
  0x11   : > { %1002 = vmatprep.subr.bf16.mxu0 %v414_v4  ;;  %1038 = vmatprep.subr.bf16.mxu1 %v414_v4  ;;  %v1070_v7 = vld [vmem:[%s1162_s24 + $0x40] sm:$0xff]   ;;  %v1072_v9 = vld [vmem:[%s1162_s24 + $0x48] sm:$0xff]   ;;  %v1074_v11 = vld [vmem:[%s1162_s24 + $0x50] sm:$0xff]  }
  0x12   : > { %1003 = vmatpush3.bf16.msra.mxu0 %v414_v4  ;;  %1040 = vmatpush3.bf16.msra.mxu1 %v414_v4  ;;  %v1075_v12 = vld [vmem:[%s1162_s24 + $0x18] sm:$0xff]   ;;  %v1077_v14 = vld [vmem:[%s1162_s24 + $0x20] sm:$0xff]   ;;  %v1079_v16 = vld [vmem:[%s1162_s24 + $0x28] sm:$0xff]  }
  0x13   : > { %1004 = vmatprep.subr.bf16.mxu0 %v1068_v5  ;;  %1039 = vmatprep.subr.bf16.mxu1 %v1068_v5  ;;  %v1076_v13 = vld [vmem:[%s1162_s24 + $0x58] sm:$0xff]   ;;  %v1078_v15 = vld [vmem:[%s1162_s24 + $0x60] sm:$0xff]   ;;  %v1080_v17 = vld [vmem:[%s1162_s24 + $0x68] sm:$0xff]  }
  0x14   : > { %1006 = vmatprep.mubr.msk.bf16.mxu0 %vm360_vm2, %v1069_v6  ;;  %1022 = vmatprep.mubr.msk.bf16.mxu1 %vm360_vm2, %v1070_v7  ;;  %v1081_v18 = vld [vmem:[%s1162_s24 + $0x30] sm:$0xff]   ;;  %v1083_v20 = vld [vmem:[%s1162_s24 + $0x38] sm:$0xff]  }
  0x15   : > { %v1082_v19 = vld [vmem:[%s1162_s24 + $0x70] sm:$0xff]   ;;  %v1084_v21 = vld [vmem:[%s1162_s24 + $0x78] sm:$0xff]  }
  0x16   : > { %1005 = vmatpush3.bf16.msra.mxu0 %v1068_v5  ;;  %1041 = vmatpush3.bf16.msra.mxu1 %v1068_v5 }
  0x19   : > { %1007 = vmatmul.mubr.msk.bf16.vlgmr.msra.gmra.mxu0 %vm360_vm2, %v1071_v8  ;;  %1023 = vmatmul.mubr.msk.bf16.vlgmr.msra.gmra.mxu1 %vm360_vm2, %v1072_v9 }
  0x1a   : > { %1010 = vmatprep.mubr.msk.bf16.mxu0 %vm360_vm2, %v1073_v10  ;;  %1026 = vmatprep.mubr.msk.bf16.mxu1 %vm360_vm2, %v1074_v11 }
  0x21   : > { %1011 = vmatmul.mubr.msk.bf16.gmra.mxu0 %vm360_vm2, %v1075_v12  ;;  %1027 = vmatmul.mubr.msk.bf16.gmra.mxu1 %vm360_vm2, %v1076_v13 }
  0x22   : > { %1014 = vmatprep.mubr.msk.bf16.mxu0 %vm360_vm2, %v1077_v14  ;;  %1030 = vmatprep.mubr.msk.bf16.mxu1 %vm360_vm2, %v1078_v15 }
  0x29   : > { %1015 = vmatmul.mubr.msk.bf16.gmra.mxu0 %vm360_vm2, %v1079_v16  ;;  %1031 = vmatmul.mubr.msk.bf16.gmra.mxu1 %vm360_vm2, %v1080_v17 }
  0x2a   : > { %1018 = vmatprep.mubr.msk.bf16.mxu0 %vm360_vm2, %v1081_v18  ;;  %1034 = vmatprep.mubr.msk.bf16.mxu1 %vm360_vm2, %v1082_v19 }
  0x31   : > { %1019 = vmatmul.mubr.msk.bf16.gmra.mxu0 %vm360_vm2, %v1083_v20  ;;  %1035 = vmatmul.mubr.msk.bf16.gmra.mxu1 %vm360_vm2, %v1084_v21 }
  0xd9   : > { %v1008_v23 = vpop.f32.mrf.mxu0  ;;  %v1024_v24 = vpop.f32.mrf.mxu1 }
  0xda   : > { %v459_v25 = vadd.f32 %v1008_v23, %v1199_v22  ;;  %v523_v26 = vadd.f32 %v1024_v24, %v1199_v22 }
  0xdb   : > { %v450_v27 = vpop.f32.mrf.mxu0  ;;  %v514_v28 = vpop.f32.mrf.mxu1 }
  0xdc   : > { %v579_v29 = vmax.f32 %v459_v25, 0.0  ;;  %v595_v30 = vmax.f32 %v523_v26, 0.0  ;;  %v451_v31 = vadd.f32 %v1199_v22, %v450_v27  ;;  %v515_v32 = vadd.f32 %v1199_v22, %v514_v28 }
  0xdd   : > { %v1009_v33 = vpop.f32.mrf.mxu0  ;;  %v1025_v34 = vpop.f32.mrf.mxu1 }
  0xde   : > { %v954_v35 = vpack.c.bf16 %v579_v29, %v579_v29  ;;  %v970_v36 = vpack.c.bf16 %v595_v30, %v595_v30  ;;  %v577_v37 = vmax.f32 %v451_v31, 0.0  ;;  %v593_v38 = vmax.f32 %v515_v32, 0.0 }
  0xdf   : > { %v462_v39 = vadd.f32 %v1009_v33, %v1199_v22  ;;  %v526_v40 = vadd.f32 %v1025_v34, %v1199_v22  ;;  %v453_v41 = vpop.f32.mrf.mxu0  ;;  %v517_v42 = vpop.f32.mrf.mxu1 }
  0xe0   : > { %740 = vst.msk [vmem:[%s1210_s29 + $0x8] sm:$0xf] %vm737_vm3, %v954_v35  ;;  %756 = vst.msk [vmem:[%s1210_s29 + $0x48] sm:$0xf] %vm737_vm3, %v970_v36  ;;  %v952_v43 = vpack.c.bf16 %v577_v37, %v577_v37  ;;  %v968_v44 = vpack.c.bf16 %v593_v38, %v593_v38  ;;  %v454_v45 = vadd.f32 %v1199_v22, %v453_v41 }
  0xe1   : > { %v518_v46 = vadd.f32 %v1199_v22, %v517_v42  ;;  %v580_v47 = vmax.f32 %v462_v39, 0.0  ;;  %v596_v48 = vmax.f32 %v526_v40, 0.0  ;;  %v1012_v49 = vpop.f32.mrf.mxu0  ;;  %v1028_v50 = vpop.f32.mrf.mxu1 }
  0xe2   : > { %738 = vst.msk [vmem:[%s1210_s29] sm:$0xf] %vm737_vm3, %v952_v43  ;;  %754 = vst.msk [vmem:[%s1210_s29 + $0x40] sm:$0xf] %vm737_vm3, %v968_v44  ;;  %v578_v51 = vmax.f32 %v454_v45, 0.0  ;;  %v475_v53 = vadd.f32 %v1012_v49, %v1199_v22  ;;  %v539_v54 = vadd.f32 %v1028_v50, %v1199_v22 }
  0xe3   : > { %v594_v52 = vmax.f32 %v518_v46, 0.0  ;;  %v955_v55 = vpack.c.bf16 %v580_v47, %v580_v47  ;;  %v971_v56 = vpack.c.bf16 %v596_v48, %v596_v48  ;;  %v466_v57 = vpop.f32.mrf.mxu0  ;;  %v530_v58 = vpop.f32.mrf.mxu1 }
  0xe4   : > { %v953_v59 = vpack.c.bf16 %v578_v51, %v578_v51  ;;  %v583_v61 = vmax.f32 %v475_v53, 0.0  ;;  %v599_v62 = vmax.f32 %v539_v54, 0.0  ;;  %v467_v63 = vadd.f32 %v1199_v22, %v466_v57 }
  0xe5   : > { %v969_v60 = vpack.c.bf16 %v594_v52, %v594_v52  ;;  %741 = vst.msk [vmem:[%s1210_s29 + $0xc] sm:$0xf] %vm737_vm3, %v955_v55  ;;  %757 = vst.msk [vmem:[%s1210_s29 + $0x4c] sm:$0xf] %vm737_vm3, %v971_v56  ;;  %v531_v0 = vadd.f32 %v1199_v22, %v530_v58  ;;  %v1013_v1 = vpop.f32.mrf.mxu0  ;;  %v1029_v2 = vpop.f32.mrf.mxu1 }
  0xe6   : > { %739 = vst.msk [vmem:[%s1210_s29 + $0x4] sm:$0xf] %vm737_vm3, %v953_v59  ;;  %v958_v3 = vpack.c.bf16 %v583_v61, %v583_v61  ;;  %v974_v4 = vpack.c.bf16 %v599_v62, %v599_v62  ;;  %v478_v5 = vadd.f32 %v1013_v1, %v1199_v22  ;;  %v542_v6 = vadd.f32 %v1029_v2, %v1199_v22 }
  0xe7   : > { %755 = vst.msk [vmem:[%s1210_s29 + $0x44] sm:$0xf] %vm737_vm3, %v969_v60  ;;  %v581_v7 = vmax.f32 %v467_v63, 0.0  ;;  %v597_v8 = vmax.f32 %v531_v0, 0.0  ;;  %v469_v9 = vpop.f32.mrf.mxu0  ;;  %v533_v10 = vpop.f32.mrf.mxu1 }
  0xe8   : > { %744 = vst.msk [vmem:[%s1210_s29 + $0x18] sm:$0xf] %vm737_vm3, %v958_v3  ;;  %760 = vst.msk [vmem:[%s1210_s29 + $0x58] sm:$0xf] %vm737_vm3, %v974_v4  ;;  %v584_v11 = vmax.f32 %v478_v5, 0.0  ;;  %v600_v12 = vmax.f32 %v542_v6, 0.0  ;;  %v470_v13 = vadd.f32 %v1199_v22, %v469_v9  ;;  %v534_v14 = vadd.f32 %v1199_v22, %v533_v10 }
  0xe9   : > { %v956_v15 = vpack.c.bf16 %v581_v7, %v581_v7  ;;  %v972_v16 = vpack.c.bf16 %v597_v8, %v597_v8  ;;  %v1016_v17 = vpop.f32.mrf.mxu0  ;;  %v1032_v18 = vpop.f32.mrf.mxu1 }
  0xea   : > { %v959_v19 = vpack.c.bf16 %v584_v11, %v584_v11  ;;  %v975_v20 = vpack.c.bf16 %v600_v12, %v600_v12  ;;  %v582_v21 = vmax.f32 %v470_v13, 0.0  ;;  %v598_v23 = vmax.f32 %v534_v14, 0.0 }
  0xeb   : > { %742 = vst.msk [vmem:[%s1210_s29 + $0x10] sm:$0xf] %vm737_vm3, %v956_v15  ;;  %758 = vst.msk [vmem:[%s1210_s29 + $0x50] sm:$0xf] %vm737_vm3, %v972_v16  ;;  %v491_v24 = vadd.f32 %v1016_v17, %v1199_v22  ;;  %v555_v25 = vadd.f32 %v1032_v18, %v1199_v22  ;;  %v482_v26 = vpop.f32.mrf.mxu0  ;;  %v546_v27 = vpop.f32.mrf.mxu1 }
  0xec   : > { %745 = vst.msk [vmem:[%s1210_s29 + $0x1c] sm:$0xf] %vm737_vm3, %v959_v19  ;;  %761 = vst.msk [vmem:[%s1210_s29 + $0x5c] sm:$0xf] %vm737_vm3, %v975_v20  ;;  %v957_v28 = vpack.c.bf16 %v582_v21, %v582_v21  ;;  %v973_v29 = vpack.c.bf16 %v598_v23, %v598_v23  ;;  %v483_v30 = vadd.f32 %v1199_v22, %v482_v26 }
  0xed   : > { %v547_v31 = vadd.f32 %v1199_v22, %v546_v27  ;;  %v587_v32 = vmax.f32 %v491_v24, 0.0  ;;  %v603_v33 = vmax.f32 %v555_v25, 0.0  ;;  %v1017_v34 = vpop.f32.mrf.mxu0  ;;  %v1033_v35 = vpop.f32.mrf.mxu1 }
  0xee   : > { %743 = vst.msk [vmem:[%s1210_s29 + $0x14] sm:$0xf] %vm737_vm3, %v957_v28  ;;  %759 = vst.msk [vmem:[%s1210_s29 + $0x54] sm:$0xf] %vm737_vm3, %v973_v29  ;;  %v585_v36 = vmax.f32 %v483_v30, 0.0  ;;  %v494_v38 = vadd.f32 %v1017_v34, %v1199_v22  ;;  %v558_v39 = vadd.f32 %v1033_v35, %v1199_v22 }
  0xef   : > { %v601_v37 = vmax.f32 %v547_v31, 0.0  ;;  %v962_v40 = vpack.c.bf16 %v587_v32, %v587_v32  ;;  %v978_v41 = vpack.c.bf16 %v603_v33, %v603_v33  ;;  %v485_v42 = vpop.f32.mrf.mxu0  ;;  %v549_v43 = vpop.f32.mrf.mxu1 }
  0xf0   : > { %v960_v44 = vpack.c.bf16 %v585_v36, %v585_v36  ;;  %v588_v46 = vmax.f32 %v494_v38, 0.0  ;;  %v604_v47 = vmax.f32 %v558_v39, 0.0  ;;  %v486_v48 = vadd.f32 %v1199_v22, %v485_v42 }
  0xf1   : > { %v976_v45 = vpack.c.bf16 %v601_v37, %v601_v37  ;;  %748 = vst.msk [vmem:[%s1210_s29 + $0x28] sm:$0xf] %vm737_vm3, %v962_v40  ;;  %764 = vst.msk [vmem:[%s1210_s29 + $0x68] sm:$0xf] %vm737_vm3, %v978_v41  ;;  %v550_v49 = vadd.f32 %v1199_v22, %v549_v43  ;;  %v1020_v50 = vpop.f32.mrf.mxu0  ;;  %v1036_v51 = vpop.f32.mrf.mxu1 }
  0xf2   : > { %746 = vst.msk [vmem:[%s1210_s29 + $0x20] sm:$0xf] %vm737_vm3, %v960_v44  ;;  %v963_v52 = vpack.c.bf16 %v588_v46, %v588_v46  ;;  %v979_v53 = vpack.c.bf16 %v604_v47, %v604_v47  ;;  %v507_v54 = vadd.f32 %v1020_v50, %v1199_v22  ;;  %v571_v55 = vadd.f32 %v1036_v51, %v1199_v22 }
  0xf3   : > { %762 = vst.msk [vmem:[%s1210_s29 + $0x60] sm:$0xf] %vm737_vm3, %v976_v45  ;;  %v586_v56 = vmax.f32 %v486_v48, 0.0  ;;  %v602_v57 = vmax.f32 %v550_v49, 0.0  ;;  %v498_v58 = vpop.f32.mrf.mxu0  ;;  %v562_v59 = vpop.f32.mrf.mxu1 }
  0xf4   : > { %749 = vst.msk [vmem:[%s1210_s29 + $0x2c] sm:$0xf] %vm737_vm3, %v963_v52  ;;  %765 = vst.msk [vmem:[%s1210_s29 + $0x6c] sm:$0xf] %vm737_vm3, %v979_v53  ;;  %v591_v60 = vmax.f32 %v507_v54, 0.0  ;;  %v607_v61 = vmax.f32 %v571_v55, 0.0  ;;  %v499_v62 = vadd.f32 %v1199_v22, %v498_v58  ;;  %v563_v63 = vadd.f32 %v1199_v22, %v562_v59 }
  0xf5   : > { %v961_v0 = vpack.c.bf16 %v586_v56, %v586_v56  ;;  %v977_v1 = vpack.c.bf16 %v602_v57, %v602_v57  ;;  %v1021_v2 = vpop.f32.mrf.mxu0  ;;  %v1037_v3 = vpop.f32.mrf.mxu1 }
  0xf6   : > { %v966_v4 = vpack.c.bf16 %v591_v60, %v591_v60  ;;  %v982_v5 = vpack.c.bf16 %v607_v61, %v607_v61  ;;  %v589_v6 = vmax.f32 %v499_v62, 0.0  ;;  %v605_v7 = vmax.f32 %v563_v63, 0.0 }
  0xf7   : > { %747 = vst.msk [vmem:[%s1210_s29 + $0x24] sm:$0xf] %vm737_vm3, %v961_v0  ;;  %763 = vst.msk [vmem:[%s1210_s29 + $0x64] sm:$0xf] %vm737_vm3, %v977_v1  ;;  %v510_v8 = vadd.f32 %v1021_v2, %v1199_v22  ;;  %v574_v9 = vadd.f32 %v1037_v3, %v1199_v22  ;;  %v501_v10 = vpop.f32.mrf.mxu0  ;;  %v565_v11 = vpop.f32.mrf.mxu1 }
  0xf8   : > { %752 = vst.msk [vmem:[%s1210_s29 + $0x38] sm:$0xf] %vm737_vm3, %v966_v4  ;;  %768 = vst.msk [vmem:[%s1210_s29 + $0x78] sm:$0xf] %vm737_vm3, %v982_v5  ;;  %v964_v12 = vpack.c.bf16 %v589_v6, %v589_v6  ;;  %v980_v13 = vpack.c.bf16 %v605_v7, %v605_v7  ;;  %v502_v14 = vadd.f32 %v1199_v22, %v501_v10 }
  0xf9   : > { %v566_v15 = vadd.f32 %v1199_v22, %v565_v11  ;;  %v592_v16 = vmax.f32 %v510_v8, 0.0  ;;  %v608_v17 = vmax.f32 %v574_v9, 0.0 }
  0xfa   : > { %750 = vst.msk [vmem:[%s1210_s29 + $0x30] sm:$0xf] %vm737_vm3, %v964_v12  ;;  %766 = vst.msk [vmem:[%s1210_s29 + $0x70] sm:$0xf] %vm737_vm3, %v980_v13  ;;  %v590_v18 = vmax.f32 %v502_v14, 0.0 }
  0xfb   : > { %v606_v19 = vmax.f32 %v566_v15, 0.0  ;;  %v967_v20 = vpack.c.bf16 %v592_v16, %v592_v16  ;;  %v983_v21 = vpack.c.bf16 %v608_v17, %v608_v17 }
  0xfc   : > { %v965_v23 = vpack.c.bf16 %v590_v18, %v590_v18 }
  0xfd   : > { %v981_v24 = vpack.c.bf16 %v606_v19, %v606_v19  ;;  %753 = vst.msk [vmem:[%s1210_s29 + $0x3c] sm:$0xf] %vm737_vm3, %v967_v20  ;;  %769 = vst.msk [vmem:[%s1210_s29 + $0x7c] sm:$0xf] %vm737_vm3, %v983_v21 }
  0xfe   : > { %751 = vst.msk [vmem:[%s1210_s29 + $0x34] sm:$0xf] %vm737_vm3, %v965_v23 }
  0xff   : > { %767 = vst.msk [vmem:[%s1210_s29 + $0x74] sm:$0xf] %vm737_vm3, %v981_v24 }
 0x100 PF: > { %s13_s14 = sadd.s32 1, %s1107_s14   ;;  %s1317_s12 = smov %s1103_s13 }
 0x101   : > { %p10_p5 = scmp.ge.s32.totalorder %s13_s14, 4   ;;  %s1318_s13 = smov %s1320_s15 }
 0x103   :  { %12 = sbr.rel (!%p10_p5) target bundleno = 2 (0x2), region = 68 }

// kernel: ours_model_forward.8
= control target key start
LH: loop header
LB: loop body
LE: loop exit
PB: predicated region body
PF: predicated region fallthrough
CT: control target
= control target key end

     0   :  { %v523_v0 = vmov 0   ;;  %vm182_vm0 = vcmask 130048   ;;  %vm384_vm1 = vcmask 257024   ;;  %s712_s1 = inlined_call_operand.vmem [shape: bf16[144,32], index: 1, kind: input, shape index: {}]   ;;  %s713_s0 = inlined_call_operand.vmem [shape: bf16[128,144], index: 0, kind: input, shape index: {}]   ;;  %s714_s2 = inlined_call_operand.vmem [shape: f32[1,32], index: 2, kind: input, shape index: {}]   ;;  %s715_s3 = inlined_call_operand.vmem [shape: bf16[128,32], index: 3, kind: output, shape index: {}]  }
   0x1   :  { %207 = vmatprep.subr.bf16.mxu0 %v523_v0  ;;  %471 = vmatprep.subr.bf16.mxu1 %v523_v0  ;;  %v490_v1 = vld [vmem:[%s712_s1 + $0x38] sm:$0xff]   ;;  %v491_v2 = vld [vmem:[%s712_s1 + $0x30] sm:$0xff]   ;;  %v492_v3 = vld [vmem:[%s712_s1 + $0x28] sm:$0xff]  }
   0x2   :  { %208 = vmatpush1.bf16.msra.mxu0 %v490_v1  ;;  %480 = vmatpush1.bf16.msra.mxu1 %v490_v1  ;;  %v493_v4 = vld [vmem:[%s712_s1 + $0x20] sm:$0xff]   ;;  %v494_v7 = vld [vmem:[%s712_s1 + $0x18] sm:$0xff]   ;;  %v495_v8 = vld [vmem:[%s712_s1 + $0x10] sm:$0xff]  }
   0x3   :  { %209 = vmatprep.subr.bf16.mxu0 %v523_v0  ;;  %472 = vmatprep.subr.bf16.mxu1 %v523_v0  ;;  %v501_v5 = vld [vmem:[%s713_s0 + $0x4] ss:$8 sps:$4 sm:$0xff]   ;;  %v499_v12 = vld [vmem:[%s713_s0] ss:$8 sps:$4 sm:$0xff]   ;;  %v505_v14 = vld [vmem:[%s713_s0 + $0x14] ss:$8 sps:$4 sm:$0xff]  }
   0x4   :  { %v504_v6 = vld [vmem:[%s713_s0 + $0x44] ss:$8 sps:$4 sm:$0xff]   ;;  %431 = vmatprep.mubr.msk.bf16.mxu0 %vm182_vm0, %v501_v5  ;;  %v502_v13 = vld [vmem:[%s713_s0 + $0x40] ss:$8 sps:$4 sm:$0xff]   ;;  %v507_v15 = vld [vmem:[%s713_s0 + $0x54] ss:$8 sps:$4 sm:$0xff]  }
   0x5   :  { %435 = vmatprep.mubr.msk.bf16.mxu1 %vm182_vm0, %v504_v6  ;;  %v496_v9 = vld [vmem:[%s712_s1 + $0x8] sm:$0xff]   ;;  %v497_v10 = vld [vmem:[%s712_s1] sm:$0xff]   ;;  %v509_v16 = vld [vmem:[%s713_s0 + $0x10] ss:$8 sps:$4 sm:$0xff]  }
   0x6   :  { %210 = vmatpush1.bf16.msra.mxu0 %v491_v2  ;;  %481 = vmatpush1.bf16.msra.mxu1 %v491_v2  ;;  %v498_v11 = vld [vmem:[%s712_s1 + $0x40] sm:$0xff]   ;;  %v510_v17 = vld [vmem:[%s713_s0 + $0x50] ss:$8 sps:$4 sm:$0xff]   ;;  %v517_v22 = vld [vmem:[%s713_s0 + $0x34] ss:$8 sps:$4 sm:$0xff]  }
   0x7   :  { %211 = vmatprep.subr.bf16.mxu0 %v523_v0  ;;  %473 = vmatprep.subr.bf16.mxu1 %v523_v0  ;;  %v511_v18 = vld [vmem:[%s713_s0 + $0x24] ss:$8 sps:$4 sm:$0xff]   ;;  %v515_v20 = vld [vmem:[%s713_s0 + $0x20] ss:$8 sps:$4 sm:$0xff]   ;;  %v519_v23 = vld [vmem:[%s713_s0 + $0x74] ss:$8 sps:$4 sm:$0xff]  }
   0x8   :  { %v513_v19 = vld [vmem:[%s713_s0 + $0x64] ss:$8 sps:$4 sm:$0xff]   ;;  %v516_v21 = vld [vmem:[%s713_s0 + $0x60] ss:$8 sps:$4 sm:$0xff]   ;;  %v521_v24 = vld [vmem:[%s713_s0 + $0x30] ss:$8 sps:$4 sm:$0xff]  }
   0x9   :  { %v522_v25 = vld [vmem:[%s713_s0 + $0x70] ss:$8 sps:$4 sm:$0xff]   ;;  %v630_v26 = vld [vmem:[%s714_s2] ss:$0 sm:$0xff] }
   0xa   :  { %212 = vmatpush1.bf16.msra.mxu0 %v492_v3  ;;  %482 = vmatpush1.bf16.msra.mxu1 %v492_v3 }
   0xb   :  { %213 = vmatprep.subr.bf16.mxu0 %v523_v0  ;;  %474 = vmatprep.subr.bf16.mxu1 %v523_v0 }
   0xe   :  { %214 = vmatpush1.bf16.msra.mxu0 %v493_v4  ;;  %483 = vmatpush1.bf16.msra.mxu1 %v493_v4 }
   0xf   :  { %215 = vmatprep.subr.bf16.mxu0 %v523_v0  ;;  %475 = vmatprep.subr.bf16.mxu1 %v523_v0 }
  0x12   :  { %216 = vmatpush1.bf16.msra.mxu0 %v494_v7  ;;  %484 = vmatpush1.bf16.msra.mxu1 %v494_v7 }
  0x13   :  { %217 = vmatprep.subr.bf16.mxu0 %v523_v0  ;;  %476 = vmatprep.subr.bf16.mxu1 %v523_v0 }
  0x16   :  { %218 = vmatpush1.bf16.msra.mxu0 %v495_v8  ;;  %485 = vmatpush1.bf16.msra.mxu1 %v495_v8 }
  0x17   :  { %219 = vmatprep.subr.bf16.mxu0 %v523_v0  ;;  %477 = vmatprep.subr.bf16.mxu1 %v523_v0 }
  0x1a   :  { %220 = vmatpush1.bf16.msra.mxu0 %v496_v9  ;;  %486 = vmatpush1.bf16.msra.mxu1 %v496_v9 }
  0x1b   :  { %221 = vmatprep.subr.bf16.mxu0 %v523_v0  ;;  %478 = vmatprep.subr.bf16.mxu1 %v523_v0 }
  0x1e   :  { %222 = vmatpush1.bf16.msra.mxu0 %v497_v10  ;;  %487 = vmatpush1.bf16.msra.mxu1 %v497_v10 }
  0x1f   :  { %237 = vmatprep.subr.bf16.mxu0 %v523_v0  ;;  %479 = vmatprep.subr.bf16.mxu1 %v523_v0 }
  0x22   :  { %238 = vmatpush2.bf16.msra.mxu0 %v498_v11  ;;  %488 = vmatpush2.bf16.msra.mxu1 %v498_v11 }
  0x25   :  { %240 = vmatmul.mubr.bf16.vlgmr.msra.gmra.mxu0 %v499_v12  ;;  %272 = vmatmul.mubr.bf16.vlgmr.msra.gmra.mxu1 %v502_v13 }
  0x26   :  { %432 = vmatprep.mubr.msk.bf16.mxu0 %vm182_vm0, %v505_v14  ;;  %436 = vmatprep.mubr.msk.bf16.mxu1 %vm182_vm0, %v507_v15 }
  0x2d   :  { %248 = vmatmul.mubr.bf16.gmra.mxu0 %v509_v16  ;;  %280 = vmatmul.mubr.bf16.gmra.mxu1 %v510_v17 }
  0x2e   :  { %433 = vmatprep.mubr.msk.bf16.mxu0 %vm182_vm0, %v511_v18  ;;  %437 = vmatprep.mubr.msk.bf16.mxu1 %vm182_vm0, %v513_v19 }
  0x35   :  { %256 = vmatmul.mubr.bf16.gmra.mxu0 %v515_v20  ;;  %288 = vmatmul.mubr.bf16.gmra.mxu1 %v516_v21 }
  0x36   :  { %434 = vmatprep.mubr.msk.bf16.mxu0 %vm182_vm0, %v517_v22  ;;  %438 = vmatprep.mubr.msk.bf16.mxu1 %vm182_vm0, %v519_v23 }
  0x3d   :  { %264 = vmatmul.mubr.bf16.gmra.mxu0 %v521_v24  ;;  %296 = vmatmul.mubr.bf16.gmra.mxu1 %v522_v25 }
  0xe5   :  { %v241_v27 = vpop.f32.mrf.mxu0  ;;  %v273_v28 = vpop.f32.mrf.mxu1 }
  0xe6   :  { %v242_v29 = vadd.f32 %v630_v26, %v241_v27  ;;  %v274_v30 = vadd.f32 %v630_v26, %v273_v28 }
  0xe7   :  { %v243_v31 = vpop.f32.mrf.mxu0  ;;  %v275_v32 = vpop.f32.mrf.mxu1 }
  0xe8   :  { %v304_v33 = vmax.f32 %v242_v29, 0.0  ;;  %v312_v34 = vmax.f32 %v274_v30, 0.0 }
  0xe9   :  { %v244_v35 = vpop.f32.mrf.mxu0  ;;  %v276_v36 = vpop.f32.mrf.mxu1 }
  0xea   :  { %v455_v37 = vpack.c.bf16 %v304_v33, %v304_v33  ;;  %v463_v38 = vpack.c.bf16 %v312_v34, %v312_v34  ;;  %v245_v39 = vadd.f32 %v630_v26, %v244_v35  ;;  %v277_v40 = vadd.f32 %v630_v26, %v276_v36 }
  0xeb   :  { %v246_v41 = vpop.f32.mrf.mxu0  ;;  %v278_v42 = vpop.f32.mrf.mxu1 }
  0xec   :  { %385 = vst.msk [vmem:[%s715_s3] sm:$0xf] %vm384_vm1, %v455_v37  ;;  %393 = vst.msk [vmem:[%s715_s3 + $0x20] sm:$0xf] %vm384_vm1, %v463_v38  ;;  %v305_v43 = vmax.f32 %v245_v39, 0.0  ;;  %v313_v44 = vmax.f32 %v277_v40, 0.0 }
  0xed   :  { %v249_v45 = vpop.f32.mrf.mxu0  ;;  %v281_v46 = vpop.f32.mrf.mxu1 }
  0xee   :  { %v456_v47 = vpack.c.bf16 %v305_v43, %v305_v43  ;;  %v464_v48 = vpack.c.bf16 %v313_v44, %v313_v44  ;;  %v250_v49 = vadd.f32 %v630_v26, %v249_v45  ;;  %v282_v50 = vadd.f32 %v630_v26, %v281_v46 }
  0xef   :  { %v251_v51 = vpop.f32.mrf.mxu0  ;;  %v283_v52 = vpop.f32.mrf.mxu1 }
  0xf0   :  { %386 = vst.msk [vmem:[%s715_s3 + $0x4] sm:$0xf] %vm384_vm1, %v456_v47  ;;  %394 = vst.msk [vmem:[%s715_s3 + $0x24] sm:$0xf] %vm384_vm1, %v464_v48  ;;  %v306_v53 = vmax.f32 %v250_v49, 0.0  ;;  %v314_v54 = vmax.f32 %v282_v50, 0.0 }
  0xf1   :  { %v252_v55 = vpop.f32.mrf.mxu0  ;;  %v284_v56 = vpop.f32.mrf.mxu1 }
  0xf2   :  { %v457_v57 = vpack.c.bf16 %v306_v53, %v306_v53  ;;  %v465_v58 = vpack.c.bf16 %v314_v54, %v314_v54  ;;  %v253_v59 = vadd.f32 %v630_v26, %v252_v55  ;;  %v285_v60 = vadd.f32 %v630_v26, %v284_v56 }
  0xf3   :  { %v254_v61 = vpop.f32.mrf.mxu0  ;;  %v286_v62 = vpop.f32.mrf.mxu1 }
  0xf4   :  { %387 = vst.msk [vmem:[%s715_s3 + $0x8] sm:$0xf] %vm384_vm1, %v457_v57  ;;  %395 = vst.msk [vmem:[%s715_s3 + $0x28] sm:$0xf] %vm384_vm1, %v465_v58  ;;  %v307_v63 = vmax.f32 %v253_v59, 0.0  ;;  %v315_v0 = vmax.f32 %v285_v60, 0.0 }
  0xf5   :  { %v257_v1 = vpop.f32.mrf.mxu0  ;;  %v289_v2 = vpop.f32.mrf.mxu1 }
  0xf6   :  { %v458_v3 = vpack.c.bf16 %v307_v63, %v307_v63  ;;  %v466_v4 = vpack.c.bf16 %v315_v0, %v315_v0  ;;  %v258_v5 = vadd.f32 %v630_v26, %v257_v1  ;;  %v290_v6 = vadd.f32 %v630_v26, %v289_v2 }
  0xf7   :  { %v259_v7 = vpop.f32.mrf.mxu0  ;;  %v291_v8 = vpop.f32.mrf.mxu1 }
  0xf8   :  { %388 = vst.msk [vmem:[%s715_s3 + $0xc] sm:$0xf] %vm384_vm1, %v458_v3  ;;  %396 = vst.msk [vmem:[%s715_s3 + $0x2c] sm:$0xf] %vm384_vm1, %v466_v4  ;;  %v308_v9 = vmax.f32 %v258_v5, 0.0  ;;  %v316_v10 = vmax.f32 %v290_v6, 0.0 }
  0xf9   :  { %v260_v11 = vpop.f32.mrf.mxu0  ;;  %v292_v12 = vpop.f32.mrf.mxu1 }
  0xfa   :  { %v459_v13 = vpack.c.bf16 %v308_v9, %v308_v9  ;;  %v467_v14 = vpack.c.bf16 %v316_v10, %v316_v10  ;;  %v261_v15 = vadd.f32 %v630_v26, %v260_v11  ;;  %v293_v16 = vadd.f32 %v630_v26, %v292_v12 }
  0xfb   :  { %v262_v17 = vpop.f32.mrf.mxu0  ;;  %v294_v18 = vpop.f32.mrf.mxu1 }
  0xfc   :  { %389 = vst.msk [vmem:[%s715_s3 + $0x10] sm:$0xf] %vm384_vm1, %v459_v13  ;;  %397 = vst.msk [vmem:[%s715_s3 + $0x30] sm:$0xf] %vm384_vm1, %v467_v14  ;;  %v309_v19 = vmax.f32 %v261_v15, 0.0  ;;  %v317_v20 = vmax.f32 %v293_v16, 0.0 }
  0xfd   :  { %v265_v21 = vpop.f32.mrf.mxu0  ;;  %v297_v22 = vpop.f32.mrf.mxu1 }
  0xfe   :  { %v460_v23 = vpack.c.bf16 %v309_v19, %v309_v19  ;;  %v468_v24 = vpack.c.bf16 %v317_v20, %v317_v20  ;;  %v266_v25 = vadd.f32 %v630_v26, %v265_v21  ;;  %v298_v27 = vadd.f32 %v630_v26, %v297_v22 }
  0xff   :  { %v267_v28 = vpop.f32.mrf.mxu0  ;;  %v299_v29 = vpop.f32.mrf.mxu1 }
 0x100   :  { %390 = vst.msk [vmem:[%s715_s3 + $0x14] sm:$0xf] %vm384_vm1, %v460_v23  ;;  %398 = vst.msk [vmem:[%s715_s3 + $0x34] sm:$0xf] %vm384_vm1, %v468_v24  ;;  %v310_v30 = vmax.f32 %v266_v25, 0.0  ;;  %v318_v31 = vmax.f32 %v298_v27, 0.0 }
 0x101   :  { %v268_v32 = vpop.f32.mrf.mxu0  ;;  %v300_v33 = vpop.f32.mrf.mxu1 }
 0x102   :  { %v461_v34 = vpack.c.bf16 %v310_v30, %v310_v30  ;;  %v469_v35 = vpack.c.bf16 %v318_v31, %v318_v31  ;;  %v269_v36 = vadd.f32 %v630_v26, %v268_v32  ;;  %v301_v37 = vadd.f32 %v630_v26, %v300_v33 }
 0x103   :  { %v270_v38 = vpop.f32.mrf.mxu0  ;;  %v302_v39 = vpop.f32.mrf.mxu1 }
 0x104   :  { %391 = vst.msk [vmem:[%s715_s3 + $0x18] sm:$0xf] %vm384_vm1, %v461_v34  ;;  %399 = vst.msk [vmem:[%s715_s3 + $0x38] sm:$0xf] %vm384_vm1, %v469_v35  ;;  %v311_v40 = vmax.f32 %v269_v36, 0.0  ;;  %v319_v41 = vmax.f32 %v301_v37, 0.0 }
 0x106   :  { %v462_v42 = vpack.c.bf16 %v311_v40, %v311_v40  ;;  %v470_v43 = vpack.c.bf16 %v319_v41, %v319_v41 }
 0x108   :  { %392 = vst.msk [vmem:[%s715_s3 + $0x1c] sm:$0xf] %vm384_vm1, %v462_v42  ;;  %400 = vst.msk [vmem:[%s715_s3 + $0x3c] sm:$0xf] %vm384_vm1, %v470_v43 }

// kernel: ours_model_forward.9
= control target key start
LH: loop header
LB: loop body
LE: loop exit
PB: predicated region body
PF: predicated region fallthrough
CT: control target
= control target key end

     0   :  { %vm318_vm0 = vcmask 261120   ;;  %vm601_vm1 = vcmask 35840   ;;  %s1128_s1 = inlined_call_operand.vmem [shape: bf16[288,5], index: 1, kind: input, shape index: {}]   ;;  %s1129_s0 = inlined_call_operand.vmem [shape: bf16[128,288], index: 0, kind: input, shape index: {}]   ;;  %s1130_s2 = inlined_call_operand.vmem [shape: f32[1,5], index: 2, kind: input, shape index: {}]   ;;  %s1131_s3 = inlined_call_operand.vmem [shape: bf16[128,5], index: 3, kind: output, shape index: {}]  }
   0x1   :  { %v815_v0 = vld [vmem:[%s1128_s1 + $0x78] sm:$0xff]   ;;  %v817_v2 = vld [vmem:[%s1128_s1 + $0x70] sm:$0xff]   ;;  %v819_v4 = vld [vmem:[%s1128_s1 + $0x68] sm:$0xff]  }
   0x2   :  { %v816_v1 = vld [vmem:[%s1128_s1 + $0x38] sm:$0xff]   ;;  %705 = vmatprep.subr.bf16.mxu0 %v815_v0  ;;  %799 = vmatprep.subr.bf16.mxu1 %v815_v0  ;;  %v818_v3 = vld [vmem:[%s1128_s1 + $0x30] sm:$0xff]   ;;  %v820_v5 = vld [vmem:[%s1128_s1 + $0x28] sm:$0xff]  }
   0x3   :  { %706 = vmatpush3.bf16.msra.mxu0 %v816_v1  ;;  %807 = vmatpush3.bf16.msra.mxu1 %v816_v1  ;;  %v821_v6 = vld [vmem:[%s1128_s1 + $0x60] sm:$0xff]   ;;  %v823_v8 = vld [vmem:[%s1128_s1 + $0x58] sm:$0xff]   ;;  %v825_v10 = vld [vmem:[%s1128_s1 + $0x50] sm:$0xff]  }
   0x4   :  { %707 = vmatprep.subr.bf16.mxu0 %v817_v2  ;;  %800 = vmatprep.subr.bf16.mxu1 %v817_v2  ;;  %v822_v7 = vld [vmem:[%s1128_s1 + $0x20] sm:$0xff]   ;;  %v824_v9 = vld [vmem:[%s1128_s1 + $0x18] sm:$0xff]   ;;  %v826_v13 = vld [vmem:[%s1128_s1 + $0x10] sm:$0xff]  }
   0x5   :  { %v833_v11 = vld [vmem:[%s1129_s0 + $0x4] ss:$12 sps:$4 sm:$0xff]   ;;  %v836_v12 = vld [vmem:[%s1129_s0 + $0x94] ss:$12 sps:$4 sm:$0xff]   ;;  %v827_v14 = vld [vmem:[%s1128_s1 + $0x48] sm:$0xff]  }
   0x6   :  { %375 = vmatprep.mubr.bf16.mxu0 %v833_v11  ;;  %423 = vmatprep.mubr.bf16.mxu1 %v836_v12  ;;  %v828_v15 = vld [vmem:[%s1128_s1 + $0x8] sm:$0xff]   ;;  %v829_v16 = vld [vmem:[%s1128_s1 + $0x40] sm:$0xff]   ;;  %v834_v20 = vld [vmem:[%s1129_s0 + $0x90] ss:$12 sps:$4 sm:$0xff]  }
   0x7   :  { %708 = vmatpush3.bf16.msra.mxu0 %v818_v3  ;;  %808 = vmatpush3.bf16.msra.mxu1 %v818_v3  ;;  %v830_v17 = vld [vmem:[%s1128_s1] sm:$0xff]   ;;  %v837_v19 = vld [vmem:[%s1128_s1 + $0x88] sm:$0xff]   ;;  %v848_v28 = vld [vmem:[%s1129_s0 + $0x30] ss:$12 sps:$4 sm:$0xff]  }
   0x8   :  { %709 = vmatprep.subr.bf16.mxu0 %v819_v4  ;;  %801 = vmatprep.subr.bf16.mxu1 %v819_v4  ;;  %v831_v18 = vld [vmem:[%s1129_s0] ss:$12 sps:$4 sm:$0xff]   ;;  %v838_v21 = vld [vmem:[%s1129_s0 + $0x1c] ss:$12 sps:$4 sm:$0xff]   ;;  %v842_v24 = vld [vmem:[%s1129_s0 + $0x18] ss:$12 sps:$4 sm:$0xff]  }
   0x9   :  { %v840_v22 = vld [vmem:[%s1129_s0 + $0xac] ss:$12 sps:$4 sm:$0xff]   ;;  %v844_v23 = vld [vmem:[%s1128_s1 + $0x80] sm:$0xff]   ;;  %v843_v25 = vld [vmem:[%s1129_s0 + $0xa8] ss:$12 sps:$4 sm:$0xff]  }
   0xa   :  { %v845_v26 = vld [vmem:[%s1129_s0 + $0x34] ss:$12 sps:$4 sm:$0xff]   ;;  %v850_v30 = vld [vmem:[%s1129_s0 + $0x4c] ss:$12 sps:$4 sm:$0xff]   ;;  %v854_v33 = vld [vmem:[%s1129_s0 + $0x50] ss:$12 sps:$4 sm:$0xff]  }
   0xb   :  { %710 = vmatpush3.bf16.msra.mxu0 %v820_v5  ;;  %809 = vmatpush3.bf16.msra.mxu1 %v820_v5  ;;  %v847_v27 = vld [vmem:[%s1129_s0 + $0x8] ss:$12 sps:$4 sm:$0xff]   ;;  %v849_v29 = vld [vmem:[%s1129_s0 + $0x20] ss:$12 sps:$4 sm:$0xff]   ;;  %v852_v31 = vld [vmem:[%s1129_s0 + $0x38] ss:$12 sps:$4 sm:$0xff]  }
   0xc   :  { %711 = vmatprep.subr.bf16.mxu0 %v821_v6  ;;  %802 = vmatprep.subr.bf16.mxu1 %v821_v6  ;;  %v853_v32 = vld [vmem:[%s1129_s0 + $0x48] ss:$12 sps:$4 sm:$0xff]   ;;  %v855_v34 = vld [vmem:[%s1129_s0 + $0x64] ss:$12 sps:$4 sm:$0xff]   ;;  %v858_v36 = vld [vmem:[%s1129_s0 + $0x60] ss:$12 sps:$4 sm:$0xff]  }
   0xd   :  { %v857_v35 = vld [vmem:[%s1129_s0 + $0x68] ss:$12 sps:$4 sm:$0xff]   ;;  %v859_v37 = vld [vmem:[%s1129_s0 + $0x80] ss:$12 sps:$4 sm:$0xff]   ;;  %v862_v39 = vld [vmem:[%s1129_s0 + $0x98] ss:$12 sps:$4 sm:$0xff]  }
   0xe   :  { %v860_v38 = vld [vmem:[%s1129_s0 + $0x7c] ss:$12 sps:$4 sm:$0xff]   ;;  %v863_v40 = vld [vmem:[%s1129_s0 + $0x78] ss:$12 sps:$4 sm:$0xff]   ;;  %v1038_v60 = vld [vmem:[%s1130_s2] ss:$0 sm:$0xff] }
   0xf   :  { %712 = vmatpush3.bf16.msra.mxu0 %v822_v7  ;;  %810 = vmatpush3.bf16.msra.mxu1 %v822_v7  ;;  %v864_v41 = vld [vmem:[%s1129_s0 + $0xb0] ss:$12 sps:$4 sm:$0xff]  }
  0x10   :  { %713 = vmatprep.subr.bf16.mxu0 %v823_v8  ;;  %803 = vmatprep.subr.bf16.mxu1 %v823_v8 }
  0x13   :  { %714 = vmatpush3.bf16.msra.mxu0 %v824_v9  ;;  %811 = vmatpush3.bf16.msra.mxu1 %v824_v9 }
  0x14   :  { %715 = vmatprep.subr.bf16.mxu0 %v825_v10  ;;  %804 = vmatprep.subr.bf16.mxu1 %v825_v10 }
  0x17   :  { %716 = vmatpush3.bf16.msra.mxu0 %v826_v13  ;;  %812 = vmatpush3.bf16.msra.mxu1 %v826_v13 }
  0x18   :  { %717 = vmatprep.subr.bf16.mxu0 %v827_v14  ;;  %805 = vmatprep.subr.bf16.mxu1 %v827_v14 }
  0x1b   :  { %718 = vmatpush3.bf16.msra.mxu0 %v828_v15  ;;  %813 = vmatpush3.bf16.msra.mxu1 %v828_v15 }
  0x1c   :  { %719 = vmatprep.subr.bf16.mxu0 %v829_v16  ;;  %806 = vmatprep.subr.bf16.mxu1 %v829_v16 }
  0x1f   :  { %720 = vmatpush3.bf16.msra.mxu0 %v830_v17  ;;  %814 = vmatpush3.bf16.msra.mxu1 %v830_v17 }
  0x20   :  { %779 = vmatprep.subr.bf16.mxu1 %v837_v19 }
  0x22   :  { %376 = vmatmul.mubr.bf16.vlgmr.msra.gmra.mxu0 %v831_v18  ;;  %424 = vmatmul.mubr.bf16.vlgmr.msra.gmra.mxu1 %v834_v20 }
  0x23   :  { %780 = vmatpush3.bf16.msra.mxu1 %v837_v19  ;;  %383 = vmatprep.mubr.bf16.mxu0 %v838_v21 }
  0x24   :  { %431 = vmatprep.mubr.bf16.mxu1 %v840_v22  ;;  %781 = vmatprep.subr.bf16.mxu1 %v844_v23 }
  0x27   :  { %782 = vmatpush3.bf16.msra.mxu1 %v844_v23 }
  0x2a   :  { %384 = vmatmul.mubr.bf16.gmra.mxu0 %v842_v24  ;;  %432 = vmatmul.mubr.bf16.gmra.mxu1 %v843_v25 }
  0x2b   :  { %391 = vmatprep.mubr.bf16.mxu0 %v845_v26  ;;  %783 = vmatprep.mubr.msk.bf16.mxu1 %vm318_vm0, %v847_v27 }
  0x32   :  { %392 = vmatmul.mubr.bf16.gmra.mxu0 %v848_v28  ;;  %784 = vmatmul.mubr.msk.bf16.vlgmr.msra.gmra.mxu1 %vm318_vm0, %v849_v29 }
  0x33   :  { %399 = vmatprep.mubr.bf16.mxu0 %v850_v30  ;;  %787 = vmatprep.mubr.msk.bf16.mxu1 %vm318_vm0, %v852_v31 }
  0x3a   :  { %400 = vmatmul.mubr.bf16.gmra.mxu0 %v853_v32  ;;  %788 = vmatmul.mubr.msk.bf16.gmra.mxu1 %vm318_vm0, %v854_v33 }
  0x3b   :  { %407 = vmatprep.mubr.bf16.mxu0 %v855_v34  ;;  %791 = vmatprep.mubr.msk.bf16.mxu1 %vm318_vm0, %v857_v35 }
  0x42   :  { %408 = vmatmul.mubr.bf16.gmra.mxu0 %v858_v36  ;;  %792 = vmatmul.mubr.msk.bf16.gmra.mxu1 %vm318_vm0, %v859_v37 }
  0x43   :  { %415 = vmatprep.mubr.bf16.mxu0 %v860_v38  ;;  %795 = vmatprep.mubr.msk.bf16.mxu1 %vm318_vm0, %v862_v39 }
  0x4a   :  { %416 = vmatmul.mubr.bf16.gmra.mxu0 %v863_v40  ;;  %796 = vmatmul.mubr.msk.bf16.gmra.mxu1 %vm318_vm0, %v864_v41 }
  0xe2   :  { %v721_v42 = vpop.f32.mrf.mxu0  ;;  %v1019_v43 = vpop.f32.mrf.mxu1 }
  0xe4   :  { %v722_v44 = vpop.f32.mrf.mxu0  ;;  %v1021_v45 = vpop.f32.mrf.mxu1 }
  0xe5   :  { %v723_v57 = vadd.f32 %v722_v44, %v721_v42 }
  0xe6   :  { %v724_v46 = vpop.f32.mrf.mxu0  ;;  %v1023_v47 = vpop.f32.mrf.mxu1 }
  0xe7   :  { %v378_v3 = vadd.f32 %v723_v57, %v1038_v60  ;;  %v759_v57 = vadd.f32 %v1021_v45, %v1019_v43 }
  0xe8   :  { %v725_v48 = vpop.f32.mrf.mxu0  ;;  %v1025_v49 = vpop.f32.mrf.mxu1 }
  0xe9   :  { %v726_v1 = vadd.f32 %v725_v48, %v724_v46  ;;  %v762_v43 = vadd.f32 %v1025_v49, %v1023_v47 }
  0xea   :  { %v727_v50 = vpop.f32.mrf.mxu0  ;;  %v1027_v51 = vpop.f32.mrf.mxu1 }
  0xeb   :  { %v381_v14 = vadd.f32 %v726_v1, %v1038_v60 }
  0xec   :  { %v728_v52 = vpop.f32.mrf.mxu0  ;;  %v1029_v53 = vpop.f32.mrf.mxu1 }
  0xed   :  { %v729_v54 = vadd.f32 %v728_v52, %v727_v50  ;;  %v765_v48 = vadd.f32 %v1029_v53, %v1027_v51 }
  0xee   :  { %v730_v55 = vpop.f32.mrf.mxu0  ;;  %v1031_v56 = vpop.f32.mrf.mxu1 }
  0xef   :  { %v386_v62 = vadd.f32 %v729_v54, %v1038_v60  ;;  %v434_v1 = vadd.f32 %v765_v48, %v1038_v60 }
  0xf0   :  { %v731_v58 = vpop.f32.mrf.mxu0  ;;  %v1033_v59 = vpop.f32.mrf.mxu1 }
  0xf1   :  { %v732_v61 = vadd.f32 %v731_v58, %v730_v55  ;;  %v768_v53 = vadd.f32 %v1033_v59, %v1031_v56  ;;  %v426_v59 = vadd.f32 %v759_v57, %v1038_v60 }
  0xf2   :  { %v733_v63 = vpop.f32.mrf.mxu0  ;;  %v785_v0 = vpop.f32.mrf.mxu1 }
  0xf3   :  { %v483_v2 = vadd.f32 %v785_v0, %v386_v62  ;;  %v389_v8 = vadd.f32 %v732_v61, %v1038_v60 }
  0xf4   :  { %v734_v4 = vpop.f32.mrf.mxu0  ;;  %v474_v5 = vpop.f32.mrf.mxu1 }
  0xf5   :  { %v691_v6 = vpack.c.bf16 %v483_v2, %v483_v2  ;;  %v475_v7 = vadd.f32 %v474_v5, %v378_v3  ;;  %v735_v11 = vadd.f32 %v734_v4, %v733_v63 }
  0xf6   :  { %v736_v9 = vpop.f32.mrf.mxu0  ;;  %v786_v10 = vpop.f32.mrf.mxu1 }
  0xf7   :  { %604 = vst.msk [vmem:[%s1131_s3 + $0x8] sm:$0xf] %vm601_vm1, %v691_v6  ;;  %v689_v12 = vpack.c.bf16 %v475_v7, %v475_v7  ;;  %v486_v13 = vadd.f32 %v786_v10, %v389_v8  ;;  %v394_v23 = vadd.f32 %v735_v11, %v1038_v60  ;;  %v437_v7 = vadd.f32 %v768_v53, %v1038_v60 }
  0xf8   :  { %v737_v15 = vpop.f32.mrf.mxu0  ;;  %v477_v16 = vpop.f32.mrf.mxu1 }
  0xf9   :  { %602 = vst.msk [vmem:[%s1131_s3] sm:$0xf] %vm601_vm1, %v689_v12  ;;  %v692_v17 = vpack.c.bf16 %v486_v13, %v486_v13  ;;  %v478_v18 = vadd.f32 %v477_v16, %v381_v14  ;;  %v738_v21 = vadd.f32 %v737_v15, %v736_v9  ;;  %v429_v12 = vadd.f32 %v762_v43, %v1038_v60 }
  0xfa   :  { %v739_v19 = vpop.f32.mrf.mxu0  ;;  %v789_v20 = vpop.f32.mrf.mxu1 }
  0xfb   :  { %605 = vst.msk [vmem:[%s1131_s3 + $0xc] sm:$0xf] %vm601_vm1, %v692_v17  ;;  %v690_v22 = vpack.c.bf16 %v478_v18, %v478_v18  ;;  %v397_v32 = vadd.f32 %v738_v21, %v1038_v60 }
  0xfc   :  { %v740_v24 = vpop.f32.mrf.mxu0  ;;  %v490_v25 = vpop.f32.mrf.mxu1 }
  0xfd   :  { %603 = vst.msk [vmem:[%s1131_s3 + $0x4] sm:$0xf] %vm601_vm1, %v690_v22  ;;  %v741_v26 = vadd.f32 %v740_v24, %v739_v19  ;;  %v491_v27 = vadd.f32 %v490_v25, %v394_v23 }
  0xfe   :  { %v742_v28 = vpop.f32.mrf.mxu0  ;;  %v790_v29 = vpop.f32.mrf.mxu1 }
  0xff   :  { %v402_v30 = vadd.f32 %v741_v26, %v1038_v60  ;;  %v693_v31 = vpack.c.bf16 %v491_v27, %v491_v27 }
 0x100   :  { %v743_v33 = vpop.f32.mrf.mxu0  ;;  %v493_v34 = vpop.f32.mrf.mxu1 }
 0x101   :  { %v499_v35 = vadd.f32 %v789_v20, %v402_v30  ;;  %606 = vst.msk [vmem:[%s1131_s3 + $0x10] sm:$0xf] %vm601_vm1, %v693_v31  ;;  %v744_v36 = vadd.f32 %v743_v33, %v742_v28  ;;  %v494_v37 = vadd.f32 %v493_v34, %v397_v32 }
 0x102   :  { %v745_v38 = vpop.f32.mrf.mxu0  ;;  %v793_v39 = vpop.f32.mrf.mxu1 }
 0x103   :  { %v695_v40 = vpack.c.bf16 %v499_v35, %v499_v35  ;;  %v405_v41 = vadd.f32 %v744_v36, %v1038_v60  ;;  %v694_v42 = vpack.c.bf16 %v494_v37, %v494_v37 }
 0x104   :  { %v746_v44 = vpop.f32.mrf.mxu0  ;;  %v506_v46 = vpop.f32.mrf.mxu1 }
 0x105   :  { %608 = vst.msk [vmem:[%s1131_s3 + $0x18] sm:$0xf] %vm601_vm1, %v695_v40  ;;  %v502_v50 = vadd.f32 %v790_v29, %v405_v41  ;;  %607 = vst.msk [vmem:[%s1131_s3 + $0x14] sm:$0xf] %vm601_vm1, %v694_v42  ;;  %v747_v52 = vadd.f32 %v746_v44, %v745_v38 }
 0x106   :  { %v748_v54 = vpop.f32.mrf.mxu0  ;;  %v794_v55 = vpop.f32.mrf.mxu1 }
 0x107   :  { %v696_v58 = vpack.c.bf16 %v502_v50, %v502_v50  ;;  %v410_v51 = vadd.f32 %v747_v52, %v1038_v60 }
 0x108   :  { %v749_v61 = vpop.f32.mrf.mxu0  ;;  %v509_v62 = vpop.f32.mrf.mxu1 }
 0x109   :  { %609 = vst.msk [vmem:[%s1131_s3 + $0x1c] sm:$0xf] %vm601_vm1, %v696_v58  ;;  %v507_v63 = vadd.f32 %v506_v46, %v410_v51  ;;  %v750_v0 = vadd.f32 %v749_v61, %v748_v54 }
 0x10a   :  { %v751_v45 = vpop.f32.mrf.mxu0  ;;  %v797_v2 = vpop.f32.mrf.mxu1 }
 0x10b   :  { %v697_v3 = vpack.c.bf16 %v507_v63, %v507_v63  ;;  %v413_v4 = vadd.f32 %v750_v0, %v1038_v60  ;;  %v531_v56 = vadd.f32 %v797_v2, %v434_v1 }
 0x10c   :  { %v752_v5 = vpop.f32.mrf.mxu0  ;;  %v522_v6 = vpop.f32.mrf.mxu1 }
 0x10d   :  { %610 = vst.msk [vmem:[%s1131_s3 + $0x20] sm:$0xf] %vm601_vm1, %v697_v3  ;;  %v510_v8 = vadd.f32 %v509_v62, %v413_v4  ;;  %v703_v9 = vpack.c.bf16 %v531_v56, %v531_v56  ;;  %v753_v47 = vadd.f32 %v752_v5, %v751_v45  ;;  %v523_v49 = vadd.f32 %v522_v6, %v426_v59 }
 0x10e   :  { %v754_v10 = vpop.f32.mrf.mxu0  ;;  %v798_v11 = vpop.f32.mrf.mxu1 }
 0x10f   :  { %v698_v13 = vpack.c.bf16 %v510_v8, %v510_v8  ;;  %616 = vst.msk [vmem:[%s1131_s3 + $0x38] sm:$0xf] %vm601_vm1, %v703_v9  ;;  %v418_v14 = vadd.f32 %v753_v47, %v1038_v60  ;;  %v701_v15 = vpack.c.bf16 %v523_v49, %v523_v49  ;;  %v534_v16 = vadd.f32 %v798_v11, %v437_v7 }
 0x110   :  { %v755_v17 = vpop.f32.mrf.mxu0  ;;  %v525_v18 = vpop.f32.mrf.mxu1 }
 0x111   :  { %611 = vst.msk [vmem:[%s1131_s3 + $0x24] sm:$0xf] %vm601_vm1, %v698_v13  ;;  %v515_v19 = vadd.f32 %v793_v39, %v418_v14  ;;  %614 = vst.msk [vmem:[%s1131_s3 + $0x30] sm:$0xf] %vm601_vm1, %v701_v15  ;;  %v704_v20 = vpack.c.bf16 %v534_v16, %v534_v16  ;;  %v756_v21 = vadd.f32 %v755_v17, %v754_v10 }
 0x112   :  { %v526_v22 = vadd.f32 %v525_v18, %v429_v12 }
 0x113   :  { %v699_v23 = vpack.c.bf16 %v515_v19, %v515_v19  ;;  %617 = vst.msk [vmem:[%s1131_s3 + $0x3c] sm:$0xf] %vm601_vm1, %v704_v20  ;;  %v421_v24 = vadd.f32 %v756_v21, %v1038_v60 }
 0x114   :  { %v702_v25 = vpack.c.bf16 %v526_v22, %v526_v22 }
 0x115   :  { %612 = vst.msk [vmem:[%s1131_s3 + $0x28] sm:$0xf] %vm601_vm1, %v699_v23  ;;  %v518_v26 = vadd.f32 %v794_v55, %v421_v24 }
 0x116   :  { %615 = vst.msk [vmem:[%s1131_s3 + $0x34] sm:$0xf] %vm601_vm1, %v702_v25 }
 0x117   :  { %v700_v27 = vpack.c.bf16 %v518_v26, %v518_v26 }
 0x119   :  { %613 = vst.msk [vmem:[%s1131_s3 + $0x2c] sm:$0xf] %vm601_vm1, %v700_v27 }

// kernel: ours_model_forward.10
= control target key start
LH: loop header
LB: loop body
LE: loop exit
PB: predicated region body
PF: predicated region fallthrough
CT: control target
= control target key end

     0   :  { %vm76_vm0 = vcmask 654336   ;;  %vm160_vm2 = vcmask 125952   ;;  %s275_s1 = inlined_call_operand.vmem [shape: bf16[80,16], index: 1, kind: input, shape index: {}]   ;;  %s276_s0 = inlined_call_operand.vmem [shape: bf16[32,80], index: 0, kind: input, shape index: {}]   ;;  %s277_s2 = inlined_call_operand.vmem [shape: f32[1,16], index: 2, kind: input, shape index: {}]   ;;  %s278_s3 = inlined_call_operand.vmem [shape: bf16[32,16], index: 3, kind: output, shape index: {}]  }
   0x1   :  { %v208_v0 = vld [vmem:[%s275_s1 + $0x20] sm:$0xff]   ;;  %v209_v1 = vld [vmem:[%s275_s1 + $0x18] sm:$0xff]   ;;  %v210_v2 = vld [vmem:[%s275_s1 + $0x10] sm:$0xff]  }
   0x2   :  { %194 = vmatprep.subr.bf16.mxu0 %v208_v0  ;;  %v213_v3 = vld [vmem:[%s276_s0] sm:$0xff]   ;;  %v211_v4 = vld [vmem:[%s275_s1 + $0x8] sm:$0xff]  }
   0x3   :  { %195 = vmatpush3.bf16.msra.mxu0 %v208_v0  ;;  %204 = vmatprep.mubr.msk.bf16.mxu0 %vm76_vm0, %v213_v3  ;;  %v212_v5 = vld [vmem:[%s275_s1] sm:$0xff]   ;;  %v214_v6 = vld [vmem:[%s276_s0 + $0x8] sm:$0xff]  }
   0x4   :  { %196 = vmatprep.subr.bf16.mxu0 %v209_v1  ;;  %v169_v7 = vld [vmem:[%s277_s2] ss:$0 sm:$0xff] }
   0x7   :  { %197 = vmatpush3.bf16.msra.mxu0 %v209_v1 }
   0x8   :  { %198 = vmatprep.subr.bf16.mxu0 %v210_v2 }
   0xb   :  { %199 = vmatpush3.bf16.msra.mxu0 %v210_v2 }
   0xc   :  { %200 = vmatprep.subr.bf16.mxu0 %v211_v4 }
   0xf   :  { %201 = vmatpush3.bf16.msra.mxu0 %v211_v4 }
  0x10   :  { %202 = vmatprep.subr.bf16.mxu0 %v212_v5 }
  0x13   :  { %203 = vmatpush3.bf16.msra.mxu0 %v212_v5 }
  0x16   :  { %205 = vmatmul.mubr.msk.bf16.vlgmr.msra.gmra.mxu0 %vm76_vm0, %v214_v6 }
  0xd6   :  { %v206_v8 = vpop.f32.mrf.mxu0 }
  0xd7   :  { %v126_v9 = vadd.f32 %v206_v8, %v169_v7 }
  0xd8   :  { %v117_v10 = vpop.f32.mrf.mxu0 }
  0xd9   :  { %vm134_vm1 = vcmp.gt.f32.partialorder %v126_v9, 0.0  ;;  %v138_v11 = vmul.f32 0.2, %v126_v9  ;;  %v118_v12 = vadd.f32 %v169_v7, %v117_v10 }
  0xda   :  { %v207_v13 = vpop.f32.mrf.mxu0 }
  0xdb   :  { %v142_v14 = vsel %vm134_vm1, %v126_v9, %v138_v11  ;;  %vm132_vm3 = vcmp.gt.f32.partialorder %v118_v12, 0.0  ;;  %v136_v15 = vmul.f32 0.2, %v118_v12  ;;  %v129_v16 = vadd.f32 %v207_v13, %v169_v7 }
  0xdc   :  { %v185_v17 = vpack.c.bf16 %v142_v14, %v142_v14  ;;  %v120_v18 = vpop.f32.mrf.mxu0 }
  0xdd   :  { %v140_v19 = vsel %vm132_vm3, %v118_v12, %v136_v15  ;;  %vm135_vm4 = vcmp.gt.f32.partialorder %v129_v16, 0.0  ;;  %v139_v20 = vmul.f32 0.2, %v129_v16  ;;  %v121_v21 = vadd.f32 %v169_v7, %v120_v18 }
  0xde   :  { %163 = vst.msk [vmem:[%s278_s3 + $0x8] sm:$0xf] %vm160_vm2, %v185_v17  ;;  %v183_v22 = vpack.c.bf16 %v140_v19, %v140_v19 }
  0xdf   :  { %v143_v23 = vsel %vm135_vm4, %v129_v16, %v139_v20  ;;  %vm133_vm5 = vcmp.gt.f32.partialorder %v121_v21, 0.0  ;;  %v137_v24 = vmul.f32 0.2, %v121_v21 }
  0xe0   :  { %161 = vst.msk [vmem:[%s278_s3] sm:$0xf] %vm160_vm2, %v183_v22  ;;  %v186_v25 = vpack.c.bf16 %v143_v23, %v143_v23 }
  0xe1   :  { %v141_v26 = vsel %vm133_vm5, %v121_v21, %v137_v24 }
  0xe2   :  { %164 = vst.msk [vmem:[%s278_s3 + $0xc] sm:$0xf] %vm160_vm2, %v186_v25  ;;  %v184_v27 = vpack.c.bf16 %v141_v26, %v141_v26 }
  0xe4   :  { %162 = vst.msk [vmem:[%s278_s3 + $0x4] sm:$0xf] %vm160_vm2, %v184_v27 }

// kernel: ours_model_forward.11
= control target key start
LH: loop header
LB: loop body
LE: loop exit
PB: predicated region body
PF: predicated region fallthrough
CT: control target
= control target key end

     0   :  { %vm202_vm1 = vcmask 257024   ;;  %s344_s1 = inlined_call_operand.vmem [shape: bf16[256,32], index: 1, kind: input, shape index: {}]   ;;  %s345_s0 = inlined_call_operand.vmem [shape: bf16[8,256], index: 0, kind: input, shape index: {}]   ;;  %s346_s2 = inlined_call_operand.vmem [shape: f32[1,32], index: 2, kind: input, shape index: {}]   ;;  %s347_s3 = inlined_call_operand.vmem [shape: bf16[8,32], index: 3, kind: output, shape index: {}]  }
   0x1   :  { %v249_v0 = vld [vmem:[%s344_s1 + $0x78] sm:$0xff]   ;;  %v251_v2 = vld [vmem:[%s344_s1 + $0x70] sm:$0xff]   ;;  %v253_v4 = vld [vmem:[%s344_s1 + $0x68] sm:$0xff]  }
   0x2   :  { %v250_v1 = vld [vmem:[%s344_s1 + $0x38] sm:$0xff]   ;;  %227 = vmatprep.subr.bf16.mxu0 %v249_v0  ;;  %v252_v3 = vld [vmem:[%s344_s1 + $0x30] sm:$0xff]   ;;  %v254_v5 = vld [vmem:[%s344_s1 + $0x28] sm:$0xff]  }
   0x3   :  { %228 = vmatpush3.bf16.msra.mxu0 %v250_v1  ;;  %v255_v6 = vld [vmem:[%s344_s1 + $0x60] sm:$0xff]   ;;  %v257_v8 = vld [vmem:[%s344_s1 + $0x58] sm:$0xff]   ;;  %v259_v10 = vld [vmem:[%s344_s1 + $0x50] sm:$0xff]  }
   0x4   :  { %229 = vmatprep.subr.bf16.mxu0 %v251_v2  ;;  %v256_v7 = vld [vmem:[%s344_s1 + $0x20] sm:$0xff]   ;;  %v258_v9 = vld [vmem:[%s344_s1 + $0x18] sm:$0xff]   ;;  %v260_v13 = vld [vmem:[%s344_s1 + $0x10] sm:$0xff]  }
   0x5   :  { %v15_v11 = vld [vmem:[%s345_s0] sm:$0xff]  ;;  %v261_v14 = vld [vmem:[%s344_s1 + $0x48] sm:$0xff]  }
   0x6   :  { %v210_v12 = vcombine.high %v15_v11, %v15_v11  ;;  %v262_v15 = vld [vmem:[%s344_s1 + $0x8] sm:$0xff]   ;;  %v263_v16 = vld [vmem:[%s344_s1 + $0x40] sm:$0xff]   ;;  %v209_v18 = vcombine.low %v15_v11, %v15_v11 }
   0x7   :  { %230 = vmatpush3.bf16.msra.mxu0 %v252_v3  ;;  %v264_v17 = vld [vmem:[%s344_s1] sm:$0xff]  }
   0x8   :  { %231 = vmatprep.subr.bf16.mxu0 %v253_v4  ;;  %190 = vmatprep.mubr.bf16.mxu0 %v210_v12  ;;  %v208_v20 = vld [vmem:[%s346_s2] ss:$0 sm:$0xff] }
   0xb   :  { %232 = vmatpush3.bf16.msra.mxu0 %v254_v5 }
   0xc   :  { %233 = vmatprep.subr.bf16.mxu0 %v255_v6 }
   0xf   :  { %234 = vmatpush3.bf16.msra.mxu0 %v256_v7 }
  0x10   :  { %235 = vmatprep.subr.bf16.mxu0 %v257_v8 }
  0x13   :  { %236 = vmatpush3.bf16.msra.mxu0 %v258_v9 }
  0x14   :  { %237 = vmatprep.subr.bf16.mxu0 %v259_v10 }
  0x17   :  { %238 = vmatpush3.bf16.msra.mxu0 %v260_v13 }
  0x18   :  { %239 = vmatprep.subr.bf16.mxu0 %v261_v14 }
  0x1b   :  { %240 = vmatpush3.bf16.msra.mxu0 %v262_v15 }
  0x1c   :  { %241 = vmatprep.subr.bf16.mxu0 %v263_v16 }
  0x1f   :  { %242 = vmatpush3.bf16.msra.mxu0 %v264_v17 }
  0x22   :  { %191 = vmatmul.mubr.bf16.vlgmr.msra.gmra.mxu0 %v209_v18 }
  0xe2   :  { %v243_v19 = vpop.f32.mrf.mxu0 }
  0xe4   :  { %v244_v21 = vpop.f32.mrf.mxu0 }
  0xe5   :  { %v245_v22 = vadd.f32 %v244_v21, %v243_v19 }
  0xe6   :  { %v246_v23 = vpop.f32.mrf.mxu0 }
  0xe7   :  { %v193_v24 = vadd.f32 %v245_v22, %v208_v20 }
  0xe8   :  { %v247_v25 = vpop.f32.mrf.mxu0 }
  0xe9   :  { %vm198_vm0 = vcmp.gt.f32.partialorder %v193_v24, 0.0  ;;  %v199_v26 = vmul.f32 0.2, %v193_v24 }
  0xeb   :  { %v200_v27 = vsel %vm198_vm0, %v193_v24, %v199_v26 }
  0xec   :  { %v201_v28 = vpack.c.bf16 %v200_v27, %v200_v27 }
  0xee   :  { %203 = vst.msk [vmem:[%s347_s3] sm:$0xf] %vm202_vm1, %v201_v28 }

// kernel: ours_model_forward.12
= control target key start
LH: loop header
LB: loop body
LE: loop exit
PB: predicated region body
PF: predicated region fallthrough
CT: control target
= control target key end

     0   :  { %v119_v0 = vmov 0.0   ;;  %vm120_vm0 = vmmov 0   ;;  %vm39_vm1 = vcmask 261120   ;;  %vm89_vm2 = vcmask 39936   ;;  %s156_s1 = inlined_call_operand.vmem [shape: bf16[32,5], index: 1, kind: input, shape index: {}]   ;;  %s157_s0 = inlined_call_operand.vmem [shape: bf16[8,32], index: 0, kind: input, shape index: {}]   ;;  %s158_s2 = inlined_call_operand.vmem [shape: f32[1,5], index: 2, kind: input, shape index: {}]   ;;  %s159_s3 = inlined_call_operand.vmem [shape: f32[8,5], index: 3, kind: output, shape index: {}]  }
   0x1   :  { %103 = vmatprep.subr.bf16.mxu0 %v119_v0  ;;  %v113_v1 = vld [vmem:[%s156_s1 + $0x8] sm:$0xff]   ;;  %107 = vmatprep.mubr.msk.bf16.mxu0 %vm120_vm0, %v119_v0  ;;  %v114_v2 = vld [vmem:[%s156_s1] sm:$0xff]  }
   0x2   :  { %104 = vmatpush3.bf16.msra.mxu0 %v113_v1  ;;  %v15_v3 = vld [vmem:[%s157_s0] sm:$0xf] }
   0x3   :  { %105 = vmatprep.subr.bf16.mxu0 %v119_v0  ;;  %v95_v4 = vld [vmem:[%s158_s2] ss:$0 sm:$0xff] }
   0x6   :  { %106 = vmatpush3.bf16.msra.mxu0 %v114_v2 }
   0x9   :  { %108 = vmatmul.mubr.msk.bf16.vlgmr.msra.gmra.mxu0 %vm39_vm1, %v15_v3 }
  0xc9   :  { %v77_v5 = vpop.f32.mrf.mxu0 }
  0xca   :  { %v78_v6 = vadd.f32 %v95_v4, %v77_v5 }
  0xcb   :  { %v109_v7 = vpop.f32.mrf.mxu0 }
  0xcc   :  { %v99_v8 = vmul.f32 -1.442695, %v78_v6 }
  0xcd   :  { %v80_v9 = vpop.f32.mrf.mxu0 }
  0xce   :  { %115 = vpow2.f32 %v99_v8 }
  0xcf   :  { %v110_v10 = vpop.f32.mrf.mxu0 }
  0xdb   :  { %v116_v11 = vpop.eup %115 }
  0xdc   :  { %v86_v12 = vadd.f32 1.0, %v116_v11 }
  0xde   :  { %117 = vrcp.f32 %v86_v12 }
  0xeb   :  { %v118_v13 = vpop.eup %117 }
  0xec   :  { %90 = vst.msk [vmem:[%s159_s3] sm:$0xff] %vm89_vm2, %v118_v13 }

// kernel: ours_model_forward.13
= control target key start
LH: loop header
LB: loop body
LE: loop exit
PB: predicated region body
PF: predicated region fallthrough
CT: control target
= control target key end

     0   :  { %vm126_vm0 = vcmask 1045504   ;;  %vm127_vm1 = vcmask 1046528   ;;  %v322_v1 = vmov 65535   ;;  %vm101_vm2 = vcmask 367616   ;;  %s451_s1 = inlined_call_operand.vmem [shape: bf16[45,5], index: 1, kind: input, shape index: {}]   ;;  %s452_s0 = inlined_call_operand.vmem [shape: bf16[128,45], index: 0, kind: input, shape index: {}]   ;;  %s453_s2 = inlined_call_operand.vmem [shape: f32[1,5], index: 2, kind: input, shape index: {}]   ;;  %s454_s3 = inlined_call_operand.vmem [shape: f32[128,5], index: 3, kind: output, shape index: {}]  }
   0x1   :  { %v311_v0 = vld [vmem:[%s451_s1 + $0x10] sm:$0x7f]   ;;  %v128_v2 = vsel %vm126_vm0, 4294967295, %v322_v1  ;;  %v312_v4 = vld [vmem:[%s451_s1 + $0x8] sm:$0xff]   ;;  %v314_v6 = vld [vmem:[%s452_s0] sm:$0xff]   ;;  %vm230_vm3 = vcmask 39936  }
   0x2   :  { %v129_v3 = vsel %vm127_vm1, %v128_v2, 0  ;;  %v315_v7 = vld [vmem:[%s452_s0 + $0x20] sm:$0xff]   ;;  %288 = vmatprep.mubr.msk.bf16.mxu0 %vm101_vm2, %v314_v6  ;;  %v316_v9 = vld [vmem:[%s452_s0 + $0x8] sm:$0xff]   ;;  %v318_v11 = vld [vmem:[%s452_s0 + $0x10] sm:$0xff]  }
   0x3   :  { %v131_v5 = vand.u32 %v311_v0, %v129_v3  ;;  %v313_v8 = vld [vmem:[%s451_s1] sm:$0xff]   ;;  %296 = vmatprep.mubr.msk.bf16.mxu1 %vm101_vm2, %v315_v7  ;;  %v317_v10 = vld [vmem:[%s452_s0 + $0x28] sm:$0xff]   ;;  %v319_v12 = vld [vmem:[%s452_s0 + $0x30] sm:$0xff]  }
   0x4   :  { %v320_v13 = vld [vmem:[%s452_s0 + $0x18] sm:$0xff]   ;;  %v251_v15 = vld [vmem:[%s453_s2] ss:$0 sm:$0xff] }
   0x5   :  { %282 = vmatprep.subr.bf16.mxu0 %v131_v5  ;;  %304 = vmatprep.subr.bf16.mxu1 %v131_v5  ;;  %v321_v14 = vld [vmem:[%s452_s0 + $0x38] sm:$0xff]  }
   0x6   :  { %283 = vmatpush3.bf16.msra.mxu0 %v131_v5  ;;  %307 = vmatpush3.bf16.msra.mxu1 %v131_v5 }
   0x7   :  { %284 = vmatprep.subr.bf16.mxu0 %v312_v4  ;;  %305 = vmatprep.subr.bf16.mxu1 %v312_v4 }
   0xa   :  { %285 = vmatpush3.bf16.msra.mxu0 %v312_v4  ;;  %308 = vmatpush3.bf16.msra.mxu1 %v312_v4 }
   0xb   :  { %286 = vmatprep.subr.bf16.mxu0 %v313_v8  ;;  %306 = vmatprep.subr.bf16.mxu1 %v313_v8 }
   0xe   :  { %287 = vmatpush3.bf16.msra.mxu0 %v313_v8  ;;  %309 = vmatpush3.bf16.msra.mxu1 %v313_v8 }
  0x11   :  { %289 = vmatmul.mubr.msk.bf16.vlgmr.msra.gmra.mxu0 %vm101_vm2, %v316_v9  ;;  %297 = vmatmul.mubr.msk.bf16.vlgmr.msra.gmra.mxu1 %vm101_vm2, %v317_v10 }
  0x12   :  { %292 = vmatprep.mubr.msk.bf16.mxu0 %vm101_vm2, %v318_v11  ;;  %300 = vmatprep.mubr.msk.bf16.mxu1 %vm101_vm2, %v319_v12 }
  0x19   :  { %293 = vmatmul.mubr.msk.bf16.gmra.mxu0 %vm101_vm2, %v320_v13  ;;  %301 = vmatmul.mubr.msk.bf16.gmra.mxu1 %vm101_vm2, %v321_v14 }
  0xd1   :  { %v290_v16 = vpop.f32.mrf.mxu0  ;;  %v298_v17 = vpop.f32.mrf.mxu1 }
  0xd2   :  { %v176_v18 = vadd.f32 %v290_v16, %v251_v15  ;;  %v208_v19 = vadd.f32 %v298_v17, %v251_v15 }
  0xd3   :  { %v167_v20 = vpop.f32.mrf.mxu0  ;;  %v199_v21 = vpop.f32.mrf.mxu1 }
  0xd4   :  { %233 = vst.msk [vmem:[%s454_s3 + $0x10] sm:$0xff] %vm230_vm3, %v176_v18  ;;  %241 = vst.msk [vmem:[%s454_s3 + $0x50] sm:$0xff] %vm230_vm3, %v208_v19  ;;  %v168_v22 = vadd.f32 %v251_v15, %v167_v20  ;;  %v200_v23 = vadd.f32 %v251_v15, %v199_v21 }
  0xd5   :  { %v291_v24 = vpop.f32.mrf.mxu0  ;;  %v299_v25 = vpop.f32.mrf.mxu1 }
  0xd6   :  { %231 = vst.msk [vmem:[%s454_s3] sm:$0xff] %vm230_vm3, %v168_v22  ;;  %239 = vst.msk [vmem:[%s454_s3 + $0x40] sm:$0xff] %vm230_vm3, %v200_v23  ;;  %v179_v26 = vadd.f32 %v291_v24, %v251_v15  ;;  %v211_v27 = vadd.f32 %v299_v25, %v251_v15 }
  0xd7   :  { %v170_v28 = vpop.f32.mrf.mxu0  ;;  %v202_v29 = vpop.f32.mrf.mxu1 }
  0xd8   :  { %234 = vst.msk [vmem:[%s454_s3 + $0x18] sm:$0xff] %vm230_vm3, %v179_v26  ;;  %242 = vst.msk [vmem:[%s454_s3 + $0x58] sm:$0xff] %vm230_vm3, %v211_v27  ;;  %v171_v30 = vadd.f32 %v251_v15, %v170_v28  ;;  %v203_v31 = vadd.f32 %v251_v15, %v202_v29 }
  0xd9   :  { %v294_v32 = vpop.f32.mrf.mxu0  ;;  %v302_v33 = vpop.f32.mrf.mxu1 }
  0xda   :  { %232 = vst.msk [vmem:[%s454_s3 + $0x8] sm:$0xff] %vm230_vm3, %v171_v30  ;;  %240 = vst.msk [vmem:[%s454_s3 + $0x48] sm:$0xff] %vm230_vm3, %v203_v31  ;;  %v192_v34 = vadd.f32 %v294_v32, %v251_v15  ;;  %v224_v35 = vadd.f32 %v302_v33, %v251_v15 }
  0xdb   :  { %v183_v36 = vpop.f32.mrf.mxu0  ;;  %v215_v37 = vpop.f32.mrf.mxu1 }
  0xdc   :  { %237 = vst.msk [vmem:[%s454_s3 + $0x30] sm:$0xff] %vm230_vm3, %v192_v34  ;;  %245 = vst.msk [vmem:[%s454_s3 + $0x70] sm:$0xff] %vm230_vm3, %v224_v35  ;;  %v184_v38 = vadd.f32 %v251_v15, %v183_v36  ;;  %v216_v39 = vadd.f32 %v251_v15, %v215_v37 }
  0xdd   :  { %v295_v40 = vpop.f32.mrf.mxu0  ;;  %v303_v41 = vpop.f32.mrf.mxu1 }
  0xde   :  { %235 = vst.msk [vmem:[%s454_s3 + $0x20] sm:$0xff] %vm230_vm3, %v184_v38  ;;  %243 = vst.msk [vmem:[%s454_s3 + $0x60] sm:$0xff] %vm230_vm3, %v216_v39  ;;  %v195_v42 = vadd.f32 %v295_v40, %v251_v15  ;;  %v227_v43 = vadd.f32 %v303_v41, %v251_v15 }
  0xdf   :  { %v186_v44 = vpop.f32.mrf.mxu0  ;;  %v218_v45 = vpop.f32.mrf.mxu1 }
  0xe0   :  { %238 = vst.msk [vmem:[%s454_s3 + $0x38] sm:$0xff] %vm230_vm3, %v195_v42  ;;  %246 = vst.msk [vmem:[%s454_s3 + $0x78] sm:$0xff] %vm230_vm3, %v227_v43  ;;  %v187_v46 = vadd.f32 %v251_v15, %v186_v44  ;;  %v219_v47 = vadd.f32 %v251_v15, %v218_v45 }
  0xe2   :  { %236 = vst.msk [vmem:[%s454_s3 + $0x28] sm:$0xff] %vm230_vm3, %v187_v46  ;;  %244 = vst.msk [vmem:[%s454_s3 + $0x68] sm:$0xff] %vm230_vm3, %v219_v47 }

</bundles_post_ra>
